<compile_context>
chip_gen: v7x
topology: tpu7x:2x2x1
jax: 0.10.0
libtpu: 0.0.40
codegen_flags: <defaults>
</compile_context>

<pallas_src>
import math
import functools

import jax
import jax.numpy as jnp
from jax.experimental import pallas as pl
from jax.experimental.pallas import tpu as pltpu


# --------------------------------------------------------------------------
# Helpers
# --------------------------------------------------------------------------
def _fit_tile(dim, target, align):
    """Largest power-of-two-ish tile <= target that divides dim, else full dim."""
    t = target
    while t >= align:
        if dim % t == 0:
            return t
        t //= 2
    return dim


@functools.lru_cache(maxsize=None)
def _vmem_limit_bytes():
    """3/4 of the physical per-core VMEM (96 MiB on v5e/v6e, 48 MiB on v7x),
    with a conservative fallback if the query fails."""
    try:
        cap = int(pltpu.get_tpu_info().vmem_capacity_bytes)
    except Exception:
        cap = 64 * 1024 * 1024
    return int(cap * 3 // 4)


# --------------------------------------------------------------------------
# Kernel 1: tiled dense linear layer  y = x @ W + b
# (W stored already transposed so it matches PyTorch's x @ weight.T + bias)
# --------------------------------------------------------------------------
def _linear_kernel(x_ref, w_ref, b_ref, o_ref, acc_ref, *, compute_dtype):
    k = pl.program_id(2)

    @pl.when(k == 0)
    def _():
        acc_ref[...] = jnp.zeros_like(acc_ref)

    acc_ref[...] += jnp.dot(x_ref[...].astype(compute_dtype),
                            w_ref[...].astype(compute_dtype),
                            preferred_element_type=jnp.float32)

    @pl.when(k == pl.num_programs(2) - 1)
    def _():
        o_ref[...] = (acc_ref[...] + b_ref[...]).astype(o_ref.dtype)


def pallas_linear(x2d, w, b, *, compute_dtype=jnp.bfloat16,
                  out_dtype=jnp.float32,
                  tm_target=512, tn_target=512, tk_target=512):
    """x2d: [N, d_in], w: [d_in, d_out], b: [1, d_out] -> [N, d_out]."""
    n, d_in = x2d.shape
    d_out = w.shape[1]

    tm = _fit_tile(n, tm_target, 8)
    tn = _fit_tile(d_out, tn_target, 128)
    tk = _fit_tile(d_in, tk_target, 128)

    grid = (n // tm, d_out // tn, d_in // tk)
    kernel = functools.partial(_linear_kernel, compute_dtype=compute_dtype)

    cost = pl.CostEstimate(
        flops=int(2 * n * d_out * d_in),
        transcendentals=0,
        bytes_accessed=int(n * d_in * x2d.dtype.itemsize
                           + d_in * d_out * w.dtype.itemsize * (n // tm)
                           + n * d_out * jnp.dtype(out_dtype).itemsize))

    return pl.pallas_call(
        kernel,
        out_shape=jax.ShapeDtypeStruct((n, d_out), out_dtype),
        grid=grid,
        in_specs=[
            pl.BlockSpec((tm, tk), lambda i, j, kk: (i, kk)),
            pl.BlockSpec((tk, tn), lambda i, j, kk: (kk, j)),
            pl.BlockSpec((1, tn), lambda i, j, kk: (0, j)),
        ],
        out_specs=pl.BlockSpec((tm, tn), lambda i, j, kk: (i, j)),
        scratch_shapes=[pltpu.VMEM((tm, tn), jnp.float32)],
        compiler_params=pltpu.CompilerParams(
            dimension_semantics=("parallel", "parallel", "arbitrary"),
            vmem_limit_bytes=_vmem_limit_bytes()),
        cost_estimate=cost,
    )(x2d, w, b)


# --------------------------------------------------------------------------
# Kernel 2: flash-style multi-head attention with fused output projection.
#   grid = (B, Sq/tq, Skv/tkv); the KV axis is the innermost reduction.
#   Per-head online softmax state (m, l) and accumulator live in VMEM scratch.
#   At the last KV step each head's normalized accumulator is contracted with
#   its d_k-row slice of W_o and the (tq, d_model) result is stored once,
#   lane-dense, with the bias already added.
# --------------------------------------------------------------------------
def _flash_mha_kernel(q_ref, k_ref, v_ref, wo_ref, bo_ref, o_ref,
                      m_ref, l_ref, acc_ref, *, h, d_k, compute_dtype):
    ki = pl.program_id(2)

    @pl.when(ki == 0)
    def _():
        m_ref[...] = jnp.full_like(m_ref, -jnp.inf)
        l_ref[...] = jnp.zeros_like(l_ref)
        acc_ref[...] = jnp.zeros_like(acc_ref)

    q = q_ref[0]      # (tq,  d_model)  -- 1/sqrt(d_k) already folded into W_q
    k = k_ref[0]      # (tkv, d_model)
    v = v_ref[0]      # (tkv, d_model)

    for hh in range(h):
        sl = slice(hh * d_k, (hh + 1) * d_k)
        qh = q[:, sl].astype(compute_dtype)
        kh = k[:, sl].astype(compute_dtype)
        vh = v[:, sl].astype(compute_dtype)

        # contract on the last dims -> no explicit K transpose before the MXU
        s = jax.lax.dot_general(qh, kh, (((1,), (1,)), ((), ())),
                                preferred_element_type=jnp.float32)  # (tq, tkv)

        m_prev = m_ref[hh]                                           # (tq, 1)
        m_new = jnp.maximum(m_prev, jnp.max(s, axis=-1, keepdims=True))
        alpha = jnp.exp(m_prev - m_new)
        p = jnp.exp(s - m_new)
        l_ref[hh] = alpha * l_ref[hh] + jnp.sum(p, axis=-1, keepdims=True)
        acc_ref[hh] = alpha * acc_ref[hh] + jnp.dot(
            p.astype(compute_dtype), vh, preferred_element_type=jnp.float32)
        m_ref[hh] = m_new

    @pl.when(ki == pl.num_programs(2) - 1)
    def _():
        # fused output projection: out = sum_h (acc_h / l_h) @ W_o[h*d_k:(h+1)*d_k] + b_o
        out = bo_ref[...].astype(jnp.float32)                        # (1, d_model)
        for hh in range(h):
            inv_l = pl.reciprocal(l_ref[hh], approx=True)            # EUP slot
            xh = (acc_ref[hh] * inv_l).astype(compute_dtype)         # (tq, d_k)
            out = out + jnp.dot(xh, wo_ref[hh * d_k:(hh + 1) * d_k, :],
                                preferred_element_type=jnp.float32)
        o_ref[0] = out.astype(o_ref.dtype)                           # lane-dense store


def pallas_flash_mha(q, k, v, wo, bo, *, h, compute_dtype=jnp.bfloat16,
                     out_dtype=jnp.float32, tq_target=256, tkv_target=512):
    """q: [B, Sq, d_model]; k, v: [B, Skv, d_model]; wo: [d_model, d_model];
    bo: [1, d_model].  Returns [B, Sq, d_model] = softmax(QK^T)V @ W_o + b_o."""
    B, Sq, d_model = q.shape
    Skv = k.shape[1]
    d_k = d_model // h

    tq = _fit_tile(Sq, tq_target, 8)
    tkv = _fit_tile(Skv, tkv_target, 8)
    grid = (B, Sq // tq, Skv // tkv)

    wo_c = wo.astype(compute_dtype)   # resident in VMEM; bf16 halves its footprint

    kernel = functools.partial(_flash_mha_kernel, h=h, d_k=d_k,
                               compute_dtype=compute_dtype)

    qkv_bytes = q.dtype.itemsize
    cost = pl.CostEstimate(
        flops=int(4 * B * Sq * Skv * d_model + 2 * B * Sq * d_model * d_model),
        transcendentals=int(B * h * Sq * Skv),
        bytes_accessed=int(B * Sq * d_model * qkv_bytes
                           + 2 * B * Skv * d_model * qkv_bytes * (Sq // tq)
                           + d_model * d_model * wo_c.dtype.itemsize
                           + B * Sq * d_model * jnp.dtype(out_dtype).itemsize))

    return pl.pallas_call(
        kernel,
        out_shape=jax.ShapeDtypeStruct((B, Sq, d_model), out_dtype),
        grid=grid,
        in_specs=[
            pl.BlockSpec((1, tq, d_model), lambda b, qi, ki: (b, qi, 0)),
            pl.BlockSpec((1, tkv, d_model), lambda b, qi, ki: (b, ki, 0)),
            pl.BlockSpec((1, tkv, d_model), lambda b, qi, ki: (b, ki, 0)),
            pl.BlockSpec((d_model, d_model), lambda b, qi, ki: (0, 0)),  # W_o resident
            pl.BlockSpec((1, d_model), lambda b, qi, ki: (0, 0)),        # b_o resident
        ],
        out_specs=pl.BlockSpec((1, tq, d_model), lambda b, qi, ki: (b, qi, 0)),
        scratch_shapes=[
            pltpu.VMEM((h, tq, 1), jnp.float32),    # running max  m
            pltpu.VMEM((h, tq, 1), jnp.float32),    # running sum  l
            pltpu.VMEM((h, tq, d_k), jnp.float32),  # per-head accumulator
        ],
        compiler_params=pltpu.CompilerParams(
            dimension_semantics=("parallel", "parallel", "arbitrary"),
            vmem_limit_bytes=_vmem_limit_bytes()),
        cost_estimate=cost,
    )(q, k, v, wo_c, bo)


# --------------------------------------------------------------------------
# MultiHeadedAttention wrapper (glue: reshapes only, no transposes)
# --------------------------------------------------------------------------
def init_mha_params(key, d_model):
    """Deterministic PyTorch-Linear-style init for the 4 projection layers."""
    bound = 1.0 / math.sqrt(d_model)
    params = []
    for i in range(4):
        kw, kb = jax.random.split(jax.random.fold_in(key, i))
        # stored already transposed: [d_in, d_out]
        w = jax.random.uniform(kw, (d_model, d_model), jnp.float32, -bound, bound)
        b = jax.random.uniform(kb, (1, d_model), jnp.float32, -bound, bound)
        params.append((w, b))
    return params


@functools.partial(jax.jit, static_argnames=("h", "compute_dtype"))
def multi_headed_attention(query, key, value, params, *, h,
                           compute_dtype=jnp.bfloat16):
    """query: [B, Sq, d_model]; key/value: [B, Skv, d_model].
    Returns [B, Sq, d_model], matching MultiHeadedAttention.forward (mask=None,
    eval-mode dropout)."""
    B, Sq, d_model = query.shape
    Skv = key.shape[1]
    d_k = d_model // h
    scale = 1.0 / math.sqrt(d_k)

    # bf16 intermediates when computing in bf16 (halves inter-kernel HBM traffic)
    act_dtype = jnp.bfloat16 if compute_dtype == jnp.bfloat16 else jnp.float32

    # Fold 1/sqrt(d_k) into the Q projection weights -> zero in-kernel cost.
    wq = params[0][0] * scale
    bq = params[0][1] * scale

    q2 = pallas_linear(query.reshape(-1, d_model), wq, bq,
                       compute_dtype=compute_dtype, out_dtype=act_dtype)
    k2 = pallas_linear(key.reshape(-1, d_model), *params[1],
                       compute_dtype=compute_dtype, out_dtype=act_dtype)
    v2 = pallas_linear(value.reshape(-1, d_model), *params[2],
                       compute_dtype=compute_dtype, out_dtype=act_dtype)

    q = q2.reshape(B, Sq, d_model)
    k = k2.reshape(B, Skv, d_model)
    v = v2.reshape(B, Skv, d_model)

    # Flash attention with the output projection (params[3]) fused in.
    return pallas_flash_mha(q, k, v, params[3][0], params[3][1], h=h,
                            compute_dtype=compute_dtype,
                            out_dtype=query.dtype)


# --------------------------------------------------------------------------
# Pure-JAX reference for correctness checking
# --------------------------------------------------------------------------
def reference_mha(query, key, value, params, *, h):
    B, Sq, d_model = query.shape
    d_k = d_model // h

    def lin(x, wb):
        w, b = wb
        return x @ w + b

    def split(t):
        Bn, Sn, _ = t.shape
        return t.reshape(Bn, Sn, h, d_k).transpose(0, 2, 1, 3)

    q = split(lin(query, params[0]))
    k = split(lin(key, params[1]))
    v = split(lin(value, params[2]))
    scores = jnp.einsum("bhqd,bhkd->bhqk", q, k) / math.sqrt(d_k)
    p = jax.nn.softmax(scores, axis=-1)
    x = jnp.einsum("bhqk,bhkd->bhqd", p, v)
    x = x.transpose(0, 2, 1, 3).reshape(B, Sq, d_model)
    return lin(x, params[3]), p


if __name__ == "__main__":
    B, S, H, D_MODEL = 2, 8, 4, 32

    root = jax.random.PRNGKey(0)
    kq, kk, kv, kp = jax.random.split(root, 4)
    query = jax.random.normal(kq, (B, S, D_MODEL), jnp.float32)
    key = jax.random.normal(kk, (B, S, D_MODEL), jnp.float32)
    value = jax.random.normal(kv, (B, S, D_MODEL), jnp.float32)
    params = init_mha_params(kp, D_MODEL)

    ref_out, _ = reference_mha(query, key, value, params, h=H)

    # --- default path: bf16 MXU compute, f32 accumulation, bf16 intermediates ---
    out = jax.block_until_ready(
        multi_headed_attention(query, key, value, params, h=H))
    assert out.shape == (B, S, D_MODEL)
    assert out.dtype == jnp.float32
    assert float(jnp.max(jnp.abs(out - ref_out))) < 8e-2

    # --- strict-parity path: f32 compute everywhere ---
    out_f32 = jax.block_until_ready(
        multi_headed_attention(query, key, value, params, h=H,
                               compute_dtype=jnp.float32))
    assert jnp.allclose(out_f32, ref_out, atol=1e-2, rtol=1e-2)

    print("KERNEL_OK")
</pallas_src>

<mosaic_0001>
module attributes {stable_mosaic.version = 11 : i64} {
  func.func @_linear_kernel(%arg0: i32, %arg1: i32, %arg2: i32, %arg3: memref<16x32xf32, #tpu.memory_space<vmem>>, %arg4: memref<32x32xf32, #tpu.memory_space<vmem>>, %arg5: memref<1x32xf32, #tpu.memory_space<vmem>>, %arg6: memref<16x32xbf16, #tpu.memory_space<vmem>>, %arg7: memref<16x32xf32, #tpu.memory_space<vmem>>) attributes {dimension_semantics = [#tpu.dimension_semantics<parallel>, #tpu.dimension_semantics<parallel>, #tpu.dimension_semantics<arbitrary>], iteration_bounds = array<i64: 1, 1, 1>, scalar_prefetch = 0 : i64, scratch_operands = 1 : i64, tpu.core_type = #tpu.core_type<tc>, window_params = [{transform_indices = @transform_0, window_bounds = array<i64: 16, 32>}, {transform_indices = @transform_1, window_bounds = array<i64: 32, 32>}, {transform_indices = @transform_2, window_bounds = array<i64: 1, 32>}, {transform_indices = @transform_3, window_bounds = array<i64: 16, 32>}]} {
    %c0_i32 = arith.constant 0 : i32
    %0 = arith.cmpi eq, %arg2, %c0_i32 : i32
    %1 = arith.extui %0 : i1 to i32
    %c0_i32_0 = arith.constant 0 : i32
    %2 = arith.cmpi ne, %1, %c0_i32_0 : i32
    scf.if %2 {
      %cst_10 = arith.constant 0.000000e+00 : f32
      %14 = vector.broadcast %cst_10 : f32 to vector<16x32xf32>
      %c0_11 = arith.constant 0 : index
      %c0_12 = arith.constant 0 : index
      %15 = vector.load %arg7[%c0_11, %c0_12] : memref<16x32xf32, #tpu.memory_space<vmem>>, vector<16x32xf32>
      tpu.vector_store %arg7[%c0_11, %c0_12], %14 {strides = array<i32>} : memref<16x32xf32, #tpu.memory_space<vmem>>, vector<16x32xf32>,
    } else {
    }
    %c0 = arith.constant 0 : index
    %c0_1 = arith.constant 0 : index
    %3 = vector.load %arg7[%c0, %c0_1] : memref<16x32xf32, #tpu.memory_space<vmem>>, vector<16x32xf32>
    %c0_2 = arith.constant 0 : index
    %c0_3 = arith.constant 0 : index
    %4 = vector.load %arg3[%c0_2, %c0_3] : memref<16x32xf32, #tpu.memory_space<vmem>>, vector<16x32xf32>
    %5 = arith.truncf %4 : vector<16x32xf32> to vector<16x32xbf16>
    %c0_4 = arith.constant 0 : index
    %c0_5 = arith.constant 0 : index
    %6 = vector.load %arg4[%c0_4, %c0_5] : memref<32x32xf32, #tpu.memory_space<vmem>>, vector<32x32xf32>
    %7 = arith.truncf %6 : vector<32x32xf32> to vector<32x32xbf16>
    %cst = arith.constant dense<0.000000e+00> : vector<16x32xf32>
    %8 = tpu.matmul %5, %7, %cst {dimension_numbers = #tpu.dot_dimension_numbers<[1], [0], [0], [1], [0, 0, 1, 1], [], []>} : vector<16x32xbf16>, vector<32x32xbf16>, vector<16x32xf32> -> vector<16x32xf32>
    %9 = arith.addf %3, %8 : vector<16x32xf32>
    %c0_6 = arith.constant 0 : index
    %c0_7 = arith.constant 0 : index
    %10 = vector.load %arg7[%c0_6, %c0_7] : memref<16x32xf32, #tpu.memory_space<vmem>>, vector<16x32xf32>
    tpu.vector_store %arg7[%c0_6, %c0_7], %9 {strides = array<i32>} : memref<16x32xf32, #tpu.memory_space<vmem>>, vector<16x32xf32>,
    %c0_i32_8 = arith.constant 0 : i32
    %11 = arith.cmpi eq, %arg2, %c0_i32_8 : i32
    %12 = arith.extui %11 : i1 to i32
    %c0_i32_9 = arith.constant 0 : i32
    %13 = arith.cmpi ne, %12, %c0_i32_9 : i32
    scf.if %13 {
      %c0_10 = arith.constant 0 : index
      %c0_11 = arith.constant 0 : index
      %14 = vector.load %arg7[%c0_10, %c0_11] : memref<16x32xf32, #tpu.memory_space<vmem>>, vector<16x32xf32>
      %c0_12 = arith.constant 0 : index
      %c0_13 = arith.constant 0 : index
      %15 = vector.load %arg5[%c0_12, %c0_13] : memref<1x32xf32, #tpu.memory_space<vmem>>, vector<1x32xf32>
      %16 = vector.broadcast %15 : vector<1x32xf32> to vector<16x32xf32>
      %17 = arith.addf %14, %16 : vector<16x32xf32>
      %18 = arith.truncf %17 : vector<16x32xf32> to vector<16x32xbf16>
      %c0_14 = arith.constant 0 : index
      %c0_15 = arith.constant 0 : index
      %19 = vector.load %arg6[%c0_14, %c0_15] : memref<16x32xbf16, #tpu.memory_space<vmem>>, vector<16x32xbf16>
      tpu.vector_store %arg6[%c0_14, %c0_15], %18 {strides = array<i32>} : memref<16x32xbf16, #tpu.memory_space<vmem>>, vector<16x32xbf16>,
    } else {
    }
    return
  }
  func.func @transform_0(%arg0: i32, %arg1: i32, %arg2: i32) -> (i32, i32) {
    %c0_i32 = arith.constant 0 : i32
    return %arg0, %arg2 : i32, i32
  }
  func.func @transform_1(%arg0: i32, %arg1: i32, %arg2: i32) -> (i32, i32) {
    %c0_i32 = arith.constant 0 : i32
    return %arg2, %arg1 : i32, i32
  }
  func.func @transform_2(%arg0: i32, %arg1: i32, %arg2: i32) -> (i32, i32) {
    %c0_i32 = arith.constant 0 : i32
    %c0_i32_0 = arith.constant 0 : i32
    return %c0_i32, %arg1 : i32, i32
  }
  func.func @transform_3(%arg0: i32, %arg1: i32, %arg2: i32) -> (i32, i32) {
    %c0_i32 = arith.constant 0 : i32
    return %arg0, %arg1 : i32, i32
  }
}

module attributes {stable_mosaic.version = 11 : i64} {
  func.func @_flash_mha_kernel(%arg0: i32, %arg1: i32, %arg2: i32, %arg3: memref<1x8x32xbf16, #tpu.memory_space<vmem>>, %arg4: memref<1x8x32xbf16, #tpu.memory_space<vmem>>, %arg5: memref<1x8x32xbf16, #tpu.memory_space<vmem>>, %arg6: memref<32x32xbf16, #tpu.memory_space<vmem>>, %arg7: memref<1x32xf32, #tpu.memory_space<vmem>>, %arg8: memref<1x8x32xf32, #tpu.memory_space<vmem>>, %arg9: memref<4x8x1xf32, #tpu.memory_space<vmem>>, %arg10: memref<4x8x1xf32, #tpu.memory_space<vmem>>, %arg11: memref<4x8x8xf32, #tpu.memory_space<vmem>>) attributes {dimension_semantics = [#tpu.dimension_semantics<parallel>, #tpu.dimension_semantics<parallel>, #tpu.dimension_semantics<arbitrary>], iteration_bounds = array<i64: 2, 1, 1>, scalar_prefetch = 0 : i64, scratch_operands = 3 : i64, tpu.core_type = #tpu.core_type<tc>, window_params = [{transform_indices = @transform_0, window_bounds = array<i64: 1, 8, 32>}, {transform_indices = @transform_1, window_bounds = array<i64: 1, 8, 32>}, {transform_indices = @transform_2, window_bounds = array<i64: 1, 8, 32>}, {pipeline_mode = #tpu.pipeline_mode<synchronous>, transform_indices = @transform_3, window_bounds = array<i64: 32, 32>}, {pipeline_mode = #tpu.pipeline_mode<synchronous>, transform_indices = @transform_4, window_bounds = array<i64: 1, 32>}, {transform_indices = @transform_5, window_bounds = array<i64: 1, 8, 32>}]} {
    %c0_i32 = arith.constant 0 : i32
    %0 = arith.cmpi eq, %arg2, %c0_i32 : i32
    %1 = arith.extui %0 : i1 to i32
    %c0_i32_0 = arith.constant 0 : i32
    %2 = arith.cmpi ne, %1, %c0_i32_0 : i32
    scf.if %2 {
      %cst_95 = arith.constant 0xFF800000 : f32
      %156 = vector.broadcast %cst_95 : f32 to vector<4x8x1xf32>
      %c0_96 = arith.constant 0 : index
      %c0_97 = arith.constant 0 : index
      %c0_98 = arith.constant 0 : index
      %157 = vector.load %arg9[%c0_96, %c0_97, %c0_98] : memref<4x8x1xf32, #tpu.memory_space<vmem>>, vector<4x8x1xf32>
      tpu.vector_store %arg9[%c0_96, %c0_97, %c0_98], %156 {strides = array<i32>} : memref<4x8x1xf32, #tpu.memory_space<vmem>>, vector<4x8x1xf32>,
      %cst_99 = arith.constant 0.000000e+00 : f32
      %158 = vector.broadcast %cst_99 : f32 to vector<4x8x1xf32>
      %c0_100 = arith.constant 0 : index
      %c0_101 = arith.constant 0 : index
      %c0_102 = arith.constant 0 : index
      %159 = vector.load %arg10[%c0_100, %c0_101, %c0_102] : memref<4x8x1xf32, #tpu.memory_space<vmem>>, vector<4x8x1xf32>
      tpu.vector_store %arg10[%c0_100, %c0_101, %c0_102], %158 {strides = array<i32>} : memref<4x8x1xf32, #tpu.memory_space<vmem>>, vector<4x8x1xf32>,
      %cst_103 = arith.constant 0.000000e+00 : f32
      %160 = vector.broadcast %cst_103 : f32 to vector<4x8x8xf32>
      %c0_104 = arith.constant 0 : index
      %c0_105 = arith.constant 0 : index
      %c0_106 = arith.constant 0 : index
      %161 = vector.load %arg11[%c0_104, %c0_105, %c0_106] : memref<4x8x8xf32, #tpu.memory_space<vmem>>, vector<4x8x8xf32>
      tpu.vector_store %arg11[%c0_104, %c0_105, %c0_106], %160 {strides = array<i32>} : memref<4x8x8xf32, #tpu.memory_space<vmem>>, vector<4x8x8xf32>,
    } else {
    }
    %c0 = arith.constant 0 : index
    %c0_1 = arith.constant 0 : index
    %c0_2 = arith.constant 0 : index
    %3 = vector.load %arg3[%c0, %c0_1, %c0_2] : memref<1x8x32xbf16, #tpu.memory_space<vmem>>, vector<1x8x32xbf16>
    %4 = vector.shape_cast %3 : vector<1x8x32xbf16> to vector<8x32xbf16>
    %c0_3 = arith.constant 0 : index
    %c0_4 = arith.constant 0 : index
    %c0_5 = arith.constant 0 : index
    %5 = vector.load %arg4[%c0_3, %c0_4, %c0_5] : memref<1x8x32xbf16, #tpu.memory_space<vmem>>, vector<1x8x32xbf16>
    %6 = vector.shape_cast %5 : vector<1x8x32xbf16> to vector<8x32xbf16>
    %c0_6 = arith.constant 0 : index
    %c0_7 = arith.constant 0 : index
    %c0_8 = arith.constant 0 : index
    %7 = vector.load %arg5[%c0_6, %c0_7, %c0_8] : memref<1x8x32xbf16, #tpu.memory_space<vmem>>, vector<1x8x32xbf16>
    %8 = vector.shape_cast %7 : vector<1x8x32xbf16> to vector<8x32xbf16>
    %9 = vector.extract_strided_slice %4 {offsets = [0, 0], sizes = [8, 8], strides = [1, 1]} : vector<8x32xbf16> to vector<8x8xbf16>
    %10 = vector.extract_strided_slice %6 {offsets = [0, 0], sizes = [8, 8], strides = [1, 1]} : vector<8x32xbf16> to vector<8x8xbf16>
    %11 = vector.extract_strided_slice %8 {offsets = [0, 0], sizes = [8, 8], strides = [1, 1]} : vector<8x32xbf16> to vector<8x8xbf16>
    %cst = arith.constant dense<0.000000e+00> : vector<8x8xf32>
    %12 = tpu.matmul %9, %10, %cst {dimension_numbers = #tpu.dot_dimension_numbers<[1], [1], [0], [0], [0, 0, 1, 0], [], []>} : vector<8x8xbf16>, vector<8x8xbf16>, vector<8x8xf32> -> vector<8x8xf32>
    %c0_9 = arith.constant 0 : index
    %c0_10 = arith.constant 0 : index
    %c0_11 = arith.constant 0 : index
    %13 = vector.load %arg9[%c0_9, %c0_10, %c0_11] : memref<4x8x1xf32, #tpu.memory_space<vmem>>, vector<1x8x1xf32>
    %14 = vector.shape_cast %13 : vector<1x8x1xf32> to vector<8x1xf32>
    %cst_12 = arith.constant dense<0xFF800000> : vector<8xf32>
    %15 = vector.multi_reduction <maximumf>, %12, %cst_12 [1] : vector<8x8xf32> to vector<8xf32>
    %16 = vector.shape_cast %15 : vector<8xf32> to vector<8x1xf32>
    %17 = arith.maximumf %14, %16 : vector<8x1xf32>
    %18 = arith.subf %14, %17 : vector<8x1xf32>
    %19 = math.exp %18 : vector<8x1xf32>
    %20 = vector.broadcast %17 : vector<8x1xf32> to vector<8x8xf32>
    %21 = arith.subf %12, %20 : vector<8x8xf32>
    %22 = math.exp %21 : vector<8x8xf32>
    %c0_13 = arith.constant 0 : index
    %c0_14 = arith.constant 0 : index
    %c0_15 = arith.constant 0 : index
    %23 = vector.load %arg10[%c0_13, %c0_14, %c0_15] : memref<4x8x1xf32, #tpu.memory_space<vmem>>, vector<1x8x1xf32>
    %24 = vector.shape_cast %23 : vector<1x8x1xf32> to vector<8x1xf32>
    %25 = arith.mulf %19, %24 : vector<8x1xf32>
    %cst_16 = arith.constant dense<0.000000e+00> : vector<8xf32>
    %26 = vector.multi_reduction <add>, %22, %cst_16 [1] : vector<8x8xf32> to vector<8xf32>
    %27 = vector.shape_cast %26 : vector<8xf32> to vector<8x1xf32>
    %28 = arith.addf %25, %27 : vector<8x1xf32>
    %c0_17 = arith.constant 0 : index
    %c0_18 = arith.constant 0 : index
    %c0_19 = arith.constant 0 : index
    %29 = vector.load %arg10[%c0_17, %c0_18, %c0_19] : memref<4x8x1xf32, #tpu.memory_space<vmem>>, vector<1x8x1xf32>
    %30 = vector.shape_cast %29 : vector<1x8x1xf32> to vector<8x1xf32>
    %31 = vector.shape_cast %28 : vector<8x1xf32> to vector<1x8x1xf32>
    tpu.vector_store %arg10[%c0_17, %c0_18, %c0_19], %31 {strides = array<i32>} : memref<4x8x1xf32, #tpu.memory_space<vmem>>, vector<1x8x1xf32>,
    %c0_20 = arith.constant 0 : index
    %c0_21 = arith.constant 0 : index
    %c0_22 = arith.constant 0 : index
    %32 = vector.load %arg11[%c0_20, %c0_21, %c0_22] : memref<4x8x8xf32, #tpu.memory_space<vmem>>, vector<1x8x8xf32>
    %33 = vector.shape_cast %32 : vector<1x8x8xf32> to vector<8x8xf32>
    %34 = vector.broadcast %19 : vector<8x1xf32> to vector<8x8xf32>
    %35 = arith.mulf %34, %33 : vector<8x8xf32>
    %36 = arith.truncf %22 : vector<8x8xf32> to vector<8x8xbf16>
    %cst_23 = arith.constant dense<0.000000e+00> : vector<8x8xf32>
    %37 = tpu.matmul %36, %11, %cst_23 {dimension_numbers = #tpu.dot_dimension_numbers<[1], [0], [0], [1], [0, 0, 1, 1], [], []>} : vector<8x8xbf16>, vector<8x8xbf16>, vector<8x8xf32> -> vector<8x8xf32>
    %38 = arith.addf %35, %37 : vector<8x8xf32>
    %c0_24 = arith.constant 0 : index
    %c0_25 = arith.constant 0 : index
    %c0_26 = arith.constant 0 : index
    %39 = vector.load %arg11[%c0_24, %c0_25, %c0_26] : memref<4x8x8xf32, #tpu.memory_space<vmem>>, vector<1x8x8xf32>
    %40 = vector.shape_cast %39 : vector<1x8x8xf32> to vector<8x8xf32>
    %41 = vector.shape_cast %38 : vector<8x8xf32> to vector<1x8x8xf32>
    tpu.vector_store %arg11[%c0_24, %c0_25, %c0_26], %41 {strides = array<i32>} : memref<4x8x8xf32, #tpu.memory_space<vmem>>, vector<1x8x8xf32>,
    %c0_27 = arith.constant 0 : index
    %c0_28 = arith.constant 0 : index
    %c0_29 = arith.constant 0 : index
    %42 = vector.load %arg9[%c0_27, %c0_28, %c0_29] : memref<4x8x1xf32, #tpu.memory_space<vmem>>, vector<1x8x1xf32>
    %43 = vector.shape_cast %42 : vector<1x8x1xf32> to vector<8x1xf32>
    %44 = vector.shape_cast %17 : vector<8x1xf32> to vector<1x8x1xf32>
    tpu.vector_store %arg9[%c0_27, %c0_28, %c0_29], %44 {strides = array<i32>} : memref<4x8x1xf32, #tpu.memory_space<vmem>>, vector<1x8x1xf32>,
    %45 = vector.extract_strided_slice %4 {offsets = [0, 8], sizes = [8, 8], strides = [1, 1]} : vector<8x32xbf16> to vector<8x8xbf16>
    %46 = vector.extract_strided_slice %6 {offsets = [0, 8], sizes = [8, 8], strides = [1, 1]} : vector<8x32xbf16> to vector<8x8xbf16>
    %47 = vector.extract_strided_slice %8 {offsets = [0, 8], sizes = [8, 8], strides = [1, 1]} : vector<8x32xbf16> to vector<8x8xbf16>
    %cst_30 = arith.constant dense<0.000000e+00> : vector<8x8xf32>
    %48 = tpu.matmul %45, %46, %cst_30 {dimension_numbers = #tpu.dot_dimension_numbers<[1], [1], [0], [0], [0, 0, 1, 0], [], []>} : vector<8x8xbf16>, vector<8x8xbf16>, vector<8x8xf32> -> vector<8x8xf32>
    %c1 = arith.constant 1 : index
    %c0_31 = arith.constant 0 : index
    %c0_32 = arith.constant 0 : index
    %49 = vector.load %arg9[%c1, %c0_31, %c0_32] : memref<4x8x1xf32, #tpu.memory_space<vmem>>, vector<1x8x1xf32>
    %50 = vector.shape_cast %49 : vector<1x8x1xf32> to vector<8x1xf32>
    %cst_33 = arith.constant dense<0xFF800000> : vector<8xf32>
    %51 = vector.multi_reduction <maximumf>, %48, %cst_33 [1] : vector<8x8xf32> to vector<8xf32>
    %52 = vector.shape_cast %51 : vector<8xf32> to vector<8x1xf32>
    %53 = arith.maximumf %50, %52 : vector<8x1xf32>
    %54 = arith.subf %50, %53 : vector<8x1xf32>
    %55 = math.exp %54 : vector<8x1xf32>
    %56 = vector.broadcast %53 : vector<8x1xf32> to vector<8x8xf32>
    %57 = arith.subf %48, %56 : vector<8x8xf32>
    %58 = math.exp %57 : vector<8x8xf32>
    %c1_34 = arith.constant 1 : index
    %c0_35 = arith.constant 0 : index
    %c0_36 = arith.constant 0 : index
    %59 = vector.load %arg10[%c1_34, %c0_35, %c0_36] : memref<4x8x1xf32, #tpu.memory_space<vmem>>, vector<1x8x1xf32>
    %60 = vector.shape_cast %59 : vector<1x8x1xf32> to vector<8x1xf32>
    %61 = arith.mulf %55, %60 : vector<8x1xf32>
    %cst_37 = arith.constant dense<0.000000e+00> : vector<8xf32>
    %62 = vector.multi_reduction <add>, %58, %cst_37 [1] : vector<8x8xf32> to vector<8xf32>
    %63 = vector.shape_cast %62 : vector<8xf32> to vector<8x1xf32>
    %64 = arith.addf %61, %63 : vector<8x1xf32>
    %c1_38 = arith.constant 1 : index
    %c0_39 = arith.constant 0 : index
    %c0_40 = arith.constant 0 : index
    %65 = vector.load %arg10[%c1_38, %c0_39, %c0_40] : memref<4x8x1xf32, #tpu.memory_space<vmem>>, vector<1x8x1xf32>
    %66 = vector.shape_cast %65 : vector<1x8x1xf32> to vector<8x1xf32>
    %67 = vector.shape_cast %64 : vector<8x1xf32> to vector<1x8x1xf32>
    tpu.vector_store %arg10[%c1_38, %c0_39, %c0_40], %67 {strides = array<i32>} : memref<4x8x1xf32, #tpu.memory_space<vmem>>, vector<1x8x1xf32>,
    %c1_41 = arith.constant 1 : index
    %c0_42 = arith.constant 0 : index
    %c0_43 = arith.constant 0 : index
    %68 = vector.load %arg11[%c1_41, %c0_42, %c0_43] : memref<4x8x8xf32, #tpu.memory_space<vmem>>, vector<1x8x8xf32>
    %69 = vector.shape_cast %68 : vector<1x8x8xf32> to vector<8x8xf32>
    %70 = vector.broadcast %55 : vector<8x1xf32> to vector<8x8xf32>
    %71 = arith.mulf %70, %69 : vector<8x8xf32>
    %72 = arith.truncf %58 : vector<8x8xf32> to vector<8x8xbf16>
    %cst_44 = arith.constant dense<0.000000e+00> : vector<8x8xf32>
    %73 = tpu.matmul %72, %47, %cst_44 {dimension_numbers = #tpu.dot_dimension_numbers<[1], [0], [0], [1], [0, 0, 1, 1], [], []>} : vector<8x8xbf16>, vector<8x8xbf16>, vector<8x8xf32> -> vector<8x8xf32>
    %74 = arith.addf %71, %73 : vector<8x8xf32>
    %c1_45 = arith.constant 1 : index
    %c0_46 = arith.constant 0 : index
    %c0_47 = arith.constant 0 : index
    %75 = vector.load %arg11[%c1_45, %c0_46, %c0_47] : memref<4x8x8xf32, #tpu.memory_space<vmem>>, vector<1x8x8xf32>
    %76 = vector.shape_cast %75 : vector<1x8x8xf32> to vector<8x8xf32>
    %77 = vector.shape_cast %74 : vector<8x8xf32> to vector<1x8x8xf32>
    tpu.vector_store %arg11[%c1_45, %c0_46, %c0_47], %77 {strides = array<i32>} : memref<4x8x8xf32, #tpu.memory_space<vmem>>, vector<1x8x8xf32>,
    %c1_48 = arith.constant 1 : index
    %c0_49 = arith.constant 0 : index
    %c0_50 = arith.constant 0 : index
    %78 = vector.load %arg9[%c1_48, %c0_49, %c0_50] : memref<4x8x1xf32, #tpu.memory_space<vmem>>, vector<1x8x1xf32>
    %79 = vector.shape_cast %78 : vector<1x8x1xf32> to vector<8x1xf32>
    %80 = vector.shape_cast %53 : vector<8x1xf32> to vector<1x8x1xf32>
    tpu.vector_store %arg9[%c1_48, %c0_49, %c0_50], %80 {strides = array<i32>} : memref<4x8x1xf32, #tpu.memory_space<vmem>>, vector<1x8x1xf32>,
    %81 = vector.extract_strided_slice %4 {offsets = [0, 16], sizes = [8, 8], strides = [1, 1]} : vector<8x32xbf16> to vector<8x8xbf16>
    %82 = vector.extract_strided_slice %6 {offsets = [0, 16], sizes = [8, 8], strides = [1, 1]} : vector<8x32xbf16> to vector<8x8xbf16>
    %83 = vector.extract_strided_slice %8 {offsets = [0, 16], sizes = [8, 8], strides = [1, 1]} : vector<8x32xbf16> to vector<8x8xbf16>
    %cst_51 = arith.constant dense<0.000000e+00> : vector<8x8xf32>
    %84 = tpu.matmul %81, %82, %cst_51 {dimension_numbers = #tpu.dot_dimension_numbers<[1], [1], [0], [0], [0, 0, 1, 0], [], []>} : vector<8x8xbf16>, vector<8x8xbf16>, vector<8x8xf32> -> vector<8x8xf32>
    %c2 = arith.constant 2 : index
    %c0_52 = arith.constant 0 : index
    %c0_53 = arith.constant 0 : index
    %85 = vector.load %arg9[%c2, %c0_52, %c0_53] : memref<4x8x1xf32, #tpu.memory_space<vmem>>, vector<1x8x1xf32>
    %86 = vector.shape_cast %85 : vector<1x8x1xf32> to vector<8x1xf32>
    %cst_54 = arith.constant dense<0xFF800000> : vector<8xf32>
    %87 = vector.multi_reduction <maximumf>, %84, %cst_54 [1] : vector<8x8xf32> to vector<8xf32>
    %88 = vector.shape_cast %87 : vector<8xf32> to vector<8x1xf32>
    %89 = arith.maximumf %86, %88 : vector<8x1xf32>
    %90 = arith.subf %86, %89 : vector<8x1xf32>
    %91 = math.exp %90 : vector<8x1xf32>
    %92 = vector.broadcast %89 : vector<8x1xf32> to vector<8x8xf32>
    %93 = arith.subf %84, %92 : vector<8x8xf32>
    %94 = math.exp %93 : vector<8x8xf32>
    %c2_55 = arith.constant 2 : index
    %c0_56 = arith.constant 0 : index
    %c0_57 = arith.constant 0 : index
    %95 = vector.load %arg10[%c2_55, %c0_56, %c0_57] : memref<4x8x1xf32, #tpu.memory_space<vmem>>, vector<1x8x1xf32>
    %96 = vector.shape_cast %95 : vector<1x8x1xf32> to vector<8x1xf32>
    %97 = arith.mulf %91, %96 : vector<8x1xf32>
    %cst_58 = arith.constant dense<0.000000e+00> : vector<8xf32>
    %98 = vector.multi_reduction <add>, %94, %cst_58 [1] : vector<8x8xf32> to vector<8xf32>
    %99 = vector.shape_cast %98 : vector<8xf32> to vector<8x1xf32>
    %100 = arith.addf %97, %99 : vector<8x1xf32>
    %c2_59 = arith.constant 2 : index
    %c0_60 = arith.constant 0 : index
    %c0_61 = arith.constant 0 : index
    %101 = vector.load %arg10[%c2_59, %c0_60, %c0_61] : memref<4x8x1xf32, #tpu.memory_space<vmem>>, vector<1x8x1xf32>
    %102 = vector.shape_cast %101 : vector<1x8x1xf32> to vector<8x1xf32>
    %103 = vector.shape_cast %100 : vector<8x1xf32> to vector<1x8x1xf32>
    tpu.vector_store %arg10[%c2_59, %c0_60, %c0_61], %103 {strides = array<i32>} : memref<4x8x1xf32, #tpu.memory_space<vmem>>, vector<1x8x1xf32>,
    %c2_62 = arith.constant 2 : index
    %c0_63 = arith.constant 0 : index
    %c0_64 = arith.constant 0 : index
    %104 = vector.load %arg11[%c2_62, %c0_63, %c0_64] : memref<4x8x8xf32, #tpu.memory_space<vmem>>, vector<1x8x8xf32>
    %105 = vector.shape_cast %104 : vector<1x8x8xf32> to vector<8x8xf32>
    %106 = vector.broadcast %91 : vector<8x1xf32> to vector<8x8xf32>
    %107 = arith.mulf %106, %105 : vector<8x8xf32>
    %108 = arith.truncf %94 : vector<8x8xf32> to vector<8x8xbf16>
    %cst_65 = arith.constant dense<0.000000e+00> : vector<8x8xf32>
    %109 = tpu.matmul %108, %83, %cst_65 {dimension_numbers = #tpu.dot_dimension_numbers<[1], [0], [0], [1], [0, 0, 1, 1], [], []>} : vector<8x8xbf16>, vector<8x8xbf16>, vector<8x8xf32> -> vector<8x8xf32>
    %110 = arith.addf %107, %109 : vector<8x8xf32>
    %c2_66 = arith.constant 2 : index
    %c0_67 = arith.constant 0 : index
    %c0_68 = arith.constant 0 : index
    %111 = vector.load %arg11[%c2_66, %c0_67, %c0_68] : memref<4x8x8xf32, #tpu.memory_space<vmem>>, vector<1x8x8xf32>
    %112 = vector.shape_cast %111 : vector<1x8x8xf32> to vector<8x8xf32>
    %113 = vector.shape_cast %110 : vector<8x8xf32> to vector<1x8x8xf32>
    tpu.vector_store %arg11[%c2_66, %c0_67, %c0_68], %113 {strides = array<i32>} : memref<4x8x8xf32, #tpu.memory_space<vmem>>, vector<1x8x8xf32>,
    %c2_69 = arith.constant 2 : index
    %c0_70 = arith.constant 0 : index
    %c0_71 = arith.constant 0 : index
    %114 = vector.load %arg9[%c2_69, %c0_70, %c0_71] : memref<4x8x1xf32, #tpu.memory_space<vmem>>, vector<1x8x1xf32>
    %115 = vector.shape_cast %114 : vector<1x8x1xf32> to vector<8x1xf32>
    %116 = vector.shape_cast %89 : vector<8x1xf32> to vector<1x8x1xf32>
    tpu.vector_store %arg9[%c2_69, %c0_70, %c0_71], %116 {strides = array<i32>} : memref<4x8x1xf32, #tpu.memory_space<vmem>>, vector<1x8x1xf32>,
    %117 = vector.extract_strided_slice %4 {offsets = [0, 24], sizes = [8, 8], strides = [1, 1]} : vector<8x32xbf16> to vector<8x8xbf16>
    %118 = vector.extract_strided_slice %6 {offsets = [0, 24], sizes = [8, 8], strides = [1, 1]} : vector<8x32xbf16> to vector<8x8xbf16>
    %119 = vector.extract_strided_slice %8 {offsets = [0, 24], sizes = [8, 8], strides = [1, 1]} : vector<8x32xbf16> to vector<8x8xbf16>
    %cst_72 = arith.constant dense<0.000000e+00> : vector<8x8xf32>
    %120 = tpu.matmul %117, %118, %cst_72 {dimension_numbers = #tpu.dot_dimension_numbers<[1], [1], [0], [0], [0, 0, 1, 0], [], []>} : vector<8x8xbf16>, vector<8x8xbf16>, vector<8x8xf32> -> vector<8x8xf32>
    %c3 = arith.constant 3 : index
    %c0_73 = arith.constant 0 : index
    %c0_74 = arith.constant 0 : index
    %121 = vector.load %arg9[%c3, %c0_73, %c0_74] : memref<4x8x1xf32, #tpu.memory_space<vmem>>, vector<1x8x1xf32>
    %122 = vector.shape_cast %121 : vector<1x8x1xf32> to vector<8x1xf32>
    %cst_75 = arith.constant dense<0xFF800000> : vector<8xf32>
    %123 = vector.multi_reduction <maximumf>, %120, %cst_75 [1] : vector<8x8xf32> to vector<8xf32>
    %124 = vector.shape_cast %123 : vector<8xf32> to vector<8x1xf32>
    %125 = arith.maximumf %122, %124 : vector<8x1xf32>
    %126 = arith.subf %122, %125 : vector<8x1xf32>
    %127 = math.exp %126 : vector<8x1xf32>
    %128 = vector.broadcast %125 : vector<8x1xf32> to vector<8x8xf32>
    %129 = arith.subf %120, %128 : vector<8x8xf32>
    %130 = math.exp %129 : vector<8x8xf32>
    %c3_76 = arith.constant 3 : index
    %c0_77 = arith.constant 0 : index
    %c0_78 = arith.constant 0 : index
    %131 = vector.load %arg10[%c3_76, %c0_77, %c0_78] : memref<4x8x1xf32, #tpu.memory_space<vmem>>, vector<1x8x1xf32>
    %132 = vector.shape_cast %131 : vector<1x8x1xf32> to vector<8x1xf32>
    %133 = arith.mulf %127, %132 : vector<8x1xf32>
    %cst_79 = arith.constant dense<0.000000e+00> : vector<8xf32>
    %134 = vector.multi_reduction <add>, %130, %cst_79 [1] : vector<8x8xf32> to vector<8xf32>
    %135 = vector.shape_cast %134 : vector<8xf32> to vector<8x1xf32>
    %136 = arith.addf %133, %135 : vector<8x1xf32>
    %c3_80 = arith.constant 3 : index
    %c0_81 = arith.constant 0 : index
    %c0_82 = arith.constant 0 : index
    %137 = vector.load %arg10[%c3_80, %c0_81, %c0_82] : memref<4x8x1xf32, #tpu.memory_space<vmem>>, vector<1x8x1xf32>
    %138 = vector.shape_cast %137 : vector<1x8x1xf32> to vector<8x1xf32>
    %139 = vector.shape_cast %136 : vector<8x1xf32> to vector<1x8x1xf32>
    tpu.vector_store %arg10[%c3_80, %c0_81, %c0_82], %139 {strides = array<i32>} : memref<4x8x1xf32, #tpu.memory_space<vmem>>, vector<1x8x1xf32>,
    %c3_83 = arith.constant 3 : index
    %c0_84 = arith.constant 0 : index
    %c0_85 = arith.constant 0 : index
    %140 = vector.load %arg11[%c3_83, %c0_84, %c0_85] : memref<4x8x8xf32, #tpu.memory_space<vmem>>, vector<1x8x8xf32>
    %141 = vector.shape_cast %140 : vector<1x8x8xf32> to vector<8x8xf32>
    %142 = vector.broadcast %127 : vector<8x1xf32> to vector<8x8xf32>
    %143 = arith.mulf %142, %141 : vector<8x8xf32>
    %144 = arith.truncf %130 : vector<8x8xf32> to vector<8x8xbf16>
    %cst_86 = arith.constant dense<0.000000e+00> : vector<8x8xf32>
    %145 = tpu.matmul %144, %119, %cst_86 {dimension_numbers = #tpu.dot_dimension_numbers<[1], [0], [0], [1], [0, 0, 1, 1], [], []>} : vector<8x8xbf16>, vector<8x8xbf16>, vector<8x8xf32> -> vector<8x8xf32>
    %146 = arith.addf %143, %145 : vector<8x8xf32>
    %c3_87 = arith.constant 3 : index
    %c0_88 = arith.constant 0 : index
    %c0_89 = arith.constant 0 : index
    %147 = vector.load %arg11[%c3_87, %c0_88, %c0_89] : memref<4x8x8xf32, #tpu.memory_space<vmem>>, vector<1x8x8xf32>
    %148 = vector.shape_cast %147 : vector<1x8x8xf32> to vector<8x8xf32>
    %149 = vector.shape_cast %146 : vector<8x8xf32> to vector<1x8x8xf32>
    tpu.vector_store %arg11[%c3_87, %c0_88, %c0_89], %149 {strides = array<i32>} : memref<4x8x8xf32, #tpu.memory_space<vmem>>, vector<1x8x8xf32>,
    %c3_90 = arith.constant 3 : index
    %c0_91 = arith.constant 0 : index
    %c0_92 = arith.constant 0 : index
    %150 = vector.load %arg9[%c3_90, %c0_91, %c0_92] : memref<4x8x1xf32, #tpu.memory_space<vmem>>, vector<1x8x1xf32>
    %151 = vector.shape_cast %150 : vector<1x8x1xf32> to vector<8x1xf32>
    %152 = vector.shape_cast %125 : vector<8x1xf32> to vector<1x8x1xf32>
    tpu.vector_store %arg9[%c3_90, %c0_91, %c0_92], %152 {strides = array<i32>} : memref<4x8x1xf32, #tpu.memory_space<vmem>>, vector<1x8x1xf32>,
    %c0_i32_93 = arith.constant 0 : i32
    %153 = arith.cmpi eq, %arg2, %c0_i32_93 : i32
    %154 = arith.extui %153 : i1 to i32
    %c0_i32_94 = arith.constant 0 : i32
    %155 = arith.cmpi ne, %154, %c0_i32_94 : i32
    scf.if %155 {
      %c0_95 = arith.constant 0 : index
      %c0_96 = arith.constant 0 : index
      %156 = vector.load %arg7[%c0_95, %c0_96] : memref<1x32xf32, #tpu.memory_space<vmem>>, vector<1x32xf32>
      %c0_97 = arith.constant 0 : index
      %c0_98 = arith.constant 0 : index
      %c0_99 = arith.constant 0 : index
      %157 = vector.load %arg10[%c0_97, %c0_98, %c0_99] : memref<4x8x1xf32, #tpu.memory_space<vmem>>, vector<1x8x1xf32>
      %158 = vector.shape_cast %157 : vector<1x8x1xf32> to vector<8x1xf32>
      %159 = tpu.reciprocal %158 {approx = true} : vector<8x1xf32> -> vector<8x1xf32>
      %c0_100 = arith.constant 0 : index
      %c0_101 = arith.constant 0 : index
      %c0_102 = arith.constant 0 : index
      %160 = vector.load %arg11[%c0_100, %c0_101, %c0_102] : memref<4x8x8xf32, #tpu.memory_space<vmem>>, vector<1x8x8xf32>
      %161 = vector.shape_cast %160 : vector<1x8x8xf32> to vector<8x8xf32>
      %162 = vector.broadcast %159 : vector<8x1xf32> to vector<8x8xf32>
      %163 = arith.mulf %161, %162 : vector<8x8xf32>
      %164 = arith.truncf %163 : vector<8x8xf32> to vector<8x8xbf16>
      %c0_103 = arith.constant 0 : index
      %c0_104 = arith.constant 0 : index
      %165 = vector.load %arg6[%c0_103, %c0_104] : memref<32x32xbf16, #tpu.memory_space<vmem>>, vector<8x32xbf16>
      %cst_105 = arith.constant dense<0.000000e+00> : vector<8x32xf32>
      %166 = tpu.matmul %164, %165, %cst_105 {dimension_numbers = #tpu.dot_dimension_numbers<[1], [0], [0], [1], [0, 0, 1, 1], [], []>} : vector<8x8xbf16>, vector<8x32xbf16>, vector<8x32xf32> -> vector<8x32xf32>
      %167 = vector.broadcast %156 : vector<1x32xf32> to vector<8x32xf32>
      %168 = arith.addf %167, %166 : vector<8x32xf32>
      %c1_106 = arith.constant 1 : index
      %c0_107 = arith.constant 0 : index
      %c0_108 = arith.constant 0 : index
      %169 = vector.load %arg10[%c1_106, %c0_107, %c0_108] : memref<4x8x1xf32, #tpu.memory_space<vmem>>, vector<1x8x1xf32>
      %170 = vector.shape_cast %169 : vector<1x8x1xf32> to vector<8x1xf32>
      %171 = tpu.reciprocal %170 {approx = true} : vector<8x1xf32> -> vector<8x1xf32>
      %c1_109 = arith.constant 1 : index
      %c0_110 = arith.constant 0 : index
      %c0_111 = arith.constant 0 : index
      %172 = vector.load %arg11[%c1_109, %c0_110, %c0_111] : memref<4x8x8xf32, #tpu.memory_space<vmem>>, vector<1x8x8xf32>
      %173 = vector.shape_cast %172 : vector<1x8x8xf32> to vector<8x8xf32>
      %174 = vector.broadcast %171 : vector<8x1xf32> to vector<8x8xf32>
      %175 = arith.mulf %173, %174 : vector<8x8xf32>
      %176 = arith.truncf %175 : vector<8x8xf32> to vector<8x8xbf16>
      %c8 = arith.constant 8 : index
      %c0_112 = arith.constant 0 : index
      %177 = vector.load %arg6[%c8, %c0_112] : memref<32x32xbf16, #tpu.memory_space<vmem>>, vector<8x32xbf16>
      %cst_113 = arith.constant dense<0.000000e+00> : vector<8x32xf32>
      %178 = tpu.matmul %176, %177, %cst_113 {dimension_numbers = #tpu.dot_dimension_numbers<[1], [0], [0], [1], [0, 0, 1, 1], [], []>} : vector<8x8xbf16>, vector<8x32xbf16>, vector<8x32xf32> -> vector<8x32xf32>
      %179 = arith.addf %168, %178 : vector<8x32xf32>
      %c2_114 = arith.constant 2 : index
      %c0_115 = arith.constant 0 : index
      %c0_116 = arith.constant 0 : index
      %180 = vector.load %arg10[%c2_114, %c0_115, %c0_116] : memref<4x8x1xf32, #tpu.memory_space<vmem>>, vector<1x8x1xf32>
      %181 = vector.shape_cast %180 : vector<1x8x1xf32> to vector<8x1xf32>
      %182 = tpu.reciprocal %181 {approx = true} : vector<8x1xf32> -> vector<8x1xf32>
      %c2_117 = arith.constant 2 : index
      %c0_118 = arith.constant 0 : index
      %c0_119 = arith.constant 0 : index
      %183 = vector.load %arg11[%c2_117, %c0_118, %c0_119] : memref<4x8x8xf32, #tpu.memory_space<vmem>>, vector<1x8x8xf32>
      %184 = vector.shape_cast %183 : vector<1x8x8xf32> to vector<8x8xf32>
      %185 = vector.broadcast %182 : vector<8x1xf32> to vector<8x8xf32>
      %186 = arith.mulf %184, %185 : vector<8x8xf32>
      %187 = arith.truncf %186 : vector<8x8xf32> to vector<8x8xbf16>
      %c16 = arith.constant 16 : index
      %c0_120 = arith.constant 0 : index
      %188 = vector.load %arg6[%c16, %c0_120] : memref<32x32xbf16, #tpu.memory_space<vmem>>, vector<8x32xbf16>
      %cst_121 = arith.constant dense<0.000000e+00> : vector<8x32xf32>
      %189 = tpu.matmul %187, %188, %cst_121 {dimension_numbers = #tpu.dot_dimension_numbers<[1], [0], [0], [1], [0, 0, 1, 1], [], []>} : vector<8x8xbf16>, vector<8x32xbf16>, vector<8x32xf32> -> vector<8x32xf32>
      %190 = arith.addf %179, %189 : vector<8x32xf32>
      %c3_122 = arith.constant 3 : index
      %c0_123 = arith.constant 0 : index
      %c0_124 = arith.constant 0 : index
      %191 = vector.load %arg10[%c3_122, %c0_123, %c0_124] : memref<4x8x1xf32, #tpu.memory_space<vmem>>, vector<1x8x1xf32>
      %192 = vector.shape_cast %191 : vector<1x8x1xf32> to vector<8x1xf32>
      %193 = tpu.reciprocal %192 {approx = true} : vector<8x1xf32> -> vector<8x1xf32>
      %c3_125 = arith.constant 3 : index
      %c0_126 = arith.constant 0 : index
      %c0_127 = arith.constant 0 : index
      %194 = vector.load %arg11[%c3_125, %c0_126, %c0_127] : memref<4x8x8xf32, #tpu.memory_space<vmem>>, vector<1x8x8xf32>
      %195 = vector.shape_cast %194 : vector<1x8x8xf32> to vector<8x8xf32>
      %196 = vector.broadcast %193 : vector<8x1xf32> to vector<8x8xf32>
      %197 = arith.mulf %195, %196 : vector<8x8xf32>
      %198 = arith.truncf %197 : vector<8x8xf32> to vector<8x8xbf16>
      %c24 = arith.constant 24 : index
      %c0_128 = arith.constant 0 : index
      %199 = vector.load %arg6[%c24, %c0_128] : memref<32x32xbf16, #tpu.memory_space<vmem>>, vector<8x32xbf16>
      %cst_129 = arith.constant dense<0.000000e+00> : vector<8x32xf32>
      %200 = tpu.matmul %198, %199, %cst_129 {dimension_numbers = #tpu.dot_dimension_numbers<[1], [0], [0], [1], [0, 0, 1, 1], [], []>} : vector<8x8xbf16>, vector<8x32xbf16>, vector<8x32xf32> -> vector<8x32xf32>
      %201 = arith.addf %190, %200 : vector<8x32xf32>
      %c0_130 = arith.constant 0 : index
      %c0_131 = arith.constant 0 : index
      %c0_132 = arith.constant 0 : index
      %202 = vector.load %arg8[%c0_130, %c0_131, %c0_132] : memref<1x8x32xf32, #tpu.memory_space<vmem>>, vector<1x8x32xf32>
      %203 = vector.shape_cast %202 : vector<1x8x32xf32> to vector<8x32xf32>
      %204 = vector.shape_cast %201 : vector<8x32xf32> to vector<1x8x32xf32>
      tpu.vector_store %arg8[%c0_130, %c0_131, %c0_132], %204 {strides = array<i32>} : memref<1x8x32xf32, #tpu.memory_space<vmem>>, vector<1x8x32xf32>,
    } else {
    }
    return
  }
  func.func @transform_0(%arg0: i32, %arg1: i32, %arg2: i32) -> (i32, i32, i32) {
    %c0_i32 = arith.constant 0 : i32
    %c0_i32_0 = arith.constant 0 : i32
    return %arg0, %arg1, %c0_i32 : i32, i32, i32
  }
  func.func @transform_1(%arg0: i32, %arg1: i32, %arg2: i32) -> (i32, i32, i32) {
    %c0_i32 = arith.constant 0 : i32
    %c0_i32_0 = arith.constant 0 : i32
    return %arg0, %arg2, %c0_i32 : i32, i32, i32
  }
  func.func @transform_2(%arg0: i32, %arg1: i32, %arg2: i32) -> (i32, i32, i32) {
    %c0_i32 = arith.constant 0 : i32
    %c0_i32_0 = arith.constant 0 : i32
    return %arg0, %arg2, %c0_i32 : i32, i32, i32
  }
  func.func @transform_3(%arg0: i32, %arg1: i32, %arg2: i32) -> (i32, i32) {
    %c0_i32 = arith.constant 0 : i32
    %c0_i32_0 = arith.constant 0 : i32
    %c0_i32_1 = arith.constant 0 : i32
    return %c0_i32, %c0_i32_0 : i32, i32
  }
  func.func @transform_4(%arg0: i32, %arg1: i32, %arg2: i32) -> (i32, i32) {
    %c0_i32 = arith.constant 0 : i32
    %c0_i32_0 = arith.constant 0 : i32
    %c0_i32_1 = arith.constant 0 : i32
    return %c0_i32, %c0_i32_0 : i32, i32
  }
  func.func @transform_5(%arg0: i32, %arg1: i32, %arg2: i32) -> (i32, i32, i32) {
    %c0_i32 = arith.constant 0 : i32
    %c0_i32_0 = arith.constant 0 : i32
    return %arg0, %arg1, %c0_i32 : i32, i32, i32
  }
}

</mosaic_0001>

<bundles_post_ra>
// kernel: multi_headed_attention.4
= control target key start
LH: loop header
LB: loop body
LE: loop exit
PB: predicated region body
PF: predicated region fallthrough
CT: control target
= control target key end

     0   :  { %vm19_vm0 = vcmask 261120   ;;  %v130_v0 = vmov 0.0   ;;  %vm131_vm1 = vmmov 0   ;;  %vm104_vm2 = vcmask 257024   ;;  %s184_s1 = inlined_call_operand.vmem [shape: f32[32,32], index: 1, kind: input, shape index: {}]   ;;  %s185_s0 = inlined_call_operand.vmem [shape: f32[16,32], index: 0, kind: input, shape index: {}]   ;;  %s186_s2 = inlined_call_operand.vmem [shape: f32[1,32], index: 2, kind: input, shape index: {}]   ;;  %s187_s3 = inlined_call_operand.vmem [shape: bf16[16,32], index: 3, kind: output, shape index: {}]  }
   0x1   :  { %120 = vmatprep.subr.bf16.mxu0 %v130_v0  ;;  %v27_v1 = vld [vmem:[%s184_s1] sm:$0xff]  ;;  %v28_v2 = vld [vmem:[%s184_s1 + $0x8] sm:$0xff]  ;;  %v29_v3 = vld [vmem:[%s184_s1 + $0x10] sm:$0xff]  ;;  %124 = vmatprep.mubr.msk.bf16.mxu0 %vm131_vm1, %v130_v0  ;;  %20 = vst.msk [vmem:[#allocation2] sm:$0xff] %vm19_vm0, %v130_v0 }
   0x2   :  { %21 = vst.msk [vmem:[#allocation2 + $0x8] sm:$0xff] %vm19_vm0, %v130_v0  ;;  %v31_v4 = vpack.c.bf16 %v28_v2, %v27_v1  ;;  %v30_v5 = vld [vmem:[%s184_s1 + $0x18] sm:$0xff]  ;;  %v24_v7 = vld [vmem:[%s185_s0] sm:$0xff]  ;;  %v25_v8 = vld [vmem:[%s185_s0 + $0x8] sm:$0xff] }
   0x3   :  { %v32_v6 = vpack.c.bf16 %v30_v5, %v29_v3  ;;  %v26_v9 = vpack.c.bf16 %v25_v8, %v24_v7  ;;  %v112_v18 = vld [vmem:[%s186_s2] ss:$0 sm:$0xff] }
   0x4   :  { %121 = vmatpush3.bf16.msra.mxu0 %v31_v4 }
   0x5   :  { %122 = vmatprep.subr.bf16.mxu0 %v130_v0 }
   0x8   :  { %123 = vmatpush3.bf16.msra.mxu0 %v32_v6  ;;  %v22_v10 = vld [vmem:[#allocation2] sm:$0xff] }
   0x9   :  { %v23_v12 = vld [vmem:[#allocation2 + $0x8] sm:$0xff] }
   0xb   :  { %125 = vmatmul.mubr.msk.bf16.vlgmr.msra.gmra.mrb[0].mxu0 %vm19_vm0, %v26_v9 }
  0xde   :  { %v71_v11 = vpop.f32.mrb[0].mxu0 }
  0xdf   :  { %v78_v13 = vadd.f32 %v71_v11, %v22_v10  ;;  %v126_v14 = vpop.f32.mrb[1].mxu0 }
  0xe0   :  { %v74_v15 = vpop.f32.mrb[2].mxu0 }
  0xe1   :  { %80 = vst.msk [vmem:[#allocation2] sm:$0xff] %vm19_vm0, %v78_v13  ;;  %v79_v16 = vadd.f32 %v74_v15, %v23_v12  ;;  %v127_v17 = vpop.f32.mrb[3].mxu0 }
  0xe3   :  { %81 = vst.msk [vmem:[#allocation2 + $0x8] sm:$0xff] %vm19_vm0, %v79_v16 }
  0xe8   :  { %v85_v19 = vld [vmem:[#allocation2] sm:$0xff] }
  0xe9   :  { %v94_v20 = vadd.f32 %v112_v18, %v85_v19 }
  0xea   :  { %v86_v21 = vld [vmem:[#allocation2 + $0x8] sm:$0xff] }
  0xeb   :  { %v115_v22 = vpack.c.bf16 %v94_v20, %v94_v20  ;;  %v95_v23 = vadd.f32 %v112_v18, %v86_v21 }
  0xed   :  { %105 = vst.msk [vmem:[%s187_s3] sm:$0xf] %vm104_vm2, %v115_v22  ;;  %v116_v24 = vpack.c.bf16 %v95_v23, %v95_v23 }
  0xef   :  { %106 = vst.msk [vmem:[%s187_s3 + $0x4] sm:$0xf] %vm104_vm2, %v116_v24 }

// kernel: multi_headed_attention.7
= control target key start
LH: loop header
LB: loop body
LE: loop exit
PB: predicated region body
PF: predicated region fallthrough
CT: control target
= control target key end

     0   :  { %10 = vsyncpa [#allocation6], 0  ;;  %s1860_s0 = inlined_call_operand.vmem [shape: bf16[2,8,32], index: 0, kind: input, shape index: {}]   ;;  %s1861_s1 = inlined_call_operand.vmem [shape: bf16[2,8,32], index: 1, kind: input, shape index: {}]   ;;  %s1862_s2 = inlined_call_operand.vmem [shape: bf16[2,8,32], index: 2, kind: input, shape index: {}]   ;;  %s1863_s3 = inlined_call_operand.vmem [shape: bf16[32,32], index: 3, kind: input, shape index: {}]   ;;  %s1864_s4 = inlined_call_operand.vmem [shape: f32[1,32], index: 4, kind: input, shape index: {}]   ;;  %s1865_s5 = inlined_call_operand.hbm [shape: f32[2,8,32], index: 5, kind: output, shape index: {}]  }
   0x1   :  { %12 = vsyncpa [#allocation6 + $0x1], 0  ;;  %s1582_s18 = smov 0   ;;  %s1584_s19 = smov 0  }
   0x2   :  { %s1586_s20 = smov 0   ;;  %s1588_s21 = smov 0  }
   0x3   :  { %s1590_s22 = smov 0   ;;  %s1592_s23 = smov 0  }
   0x4 LB: > { %s1236_s24 = sadd.s32 4294967295, %s1542_s23   ;;  %s1237_s25 = sadd.s32 4294967294, %s1542_s23   ;;  %s1542_s23 = sphi %s1592_s23, %s18_s23   ;;  %s1538_s22 = sphi %s1590_s22, %s1872_s22   ;;  %s1534_s21 = sphi %s1588_s21, %s1871_s21   ;;  %s1530_s20 = sphi %s1586_s20, %s1870_s20   ;;  %s1526_s19 = sphi %s1584_s19, %s1869_s19   ;;  %s1522_s18 = sphi %s1582_s18, %s1868_s18  }
   0x5   : > { %s37_s26 = sadd.s32 1, %s1538_s22  ;;  %s172_s27 = sadd.s32 1, %s1530_s20 }
   0x6   : > { %p39_p0 = scmp.ge.s32.totalorder %s37_s26, 2  ;;  %p182_p1 = scmp.ne.s32.totalorder %s1530_s20, %s1526_s19 }
   0x7   : > { %p183_p2 = scmp.eq.s32.totalorder %s1236_s24, 1  ;;  %p188_p3 = scmp.ne.s32.totalorder %s1526_s19, %s1522_s18 }
   0x8   : > { %s1874_s26 = smov (%p39_p0, %s37_s26), 0  ;;  %p189_p5 = scmp.eq.s32.totalorder %s1237_s25, 1 }
   0x9   : > { %p1622_p4 = por %p183_p2, %p182_p1  ;;  %s167_s29 = ssub.s32 %s1538_s22, %s1874_s26 }
   0xa   : > { %p1240_p6 = scmp.ge.s32.totalorder %s1542_s23, 1  ;;  %p170_p7 = scmp.eq.s32.totalorder %s167_s29, 0 }
   0xb   : > { %p1629_p8 = por %p189_p5, %p188_p3  ;;  %p243_p9 = scmp.lt.s32.totalorder %s1542_s23, 3 }
   0xc   : > { %s1635_s6 = scalar_select %p170_p7, %s1530_s20, %s172_s27  }
   0xd   : > { %p244_p10 = pnand %p1240_p6, %p243_p9 }
   0xe   : > { %p287_p11 = scmp.lt.s32.totalorder (!%p244_p10), %s1534_s21, 1  ;;  %vm322_vm0 = vcmask (!%p244_p10), 64512   ;;  %v1544_v0 = vmov (!%p244_p10), 0.0   ;;  %vm1545_vm1 = vmmov (!%p244_p10), 0   ;;  %s1546_s15 = smov (!%p244_p10), 120   ;;  %vm313_vm2 = vcmask (!%p244_p10), 7168  }
   0xf   : > { %247 = sbr.rel (%p244_p10) target bundleno = 1593 (0x639), region = 40  ;;  %1289 = vmatprep.subr.bf16.mxu0 (!%p244_p10), %v1544_v0  ;;  %323 = vst.msk [vmem:[#allocation4] sm:$0xff] (!%p244_p10), %vm322_vm0, %v1544_v0  ;;  %324 = vst.msk [vmem:[#allocation4 + $0x8] sm:$0xff] (!%p244_p10), %vm322_vm0, %v1544_v0  ;;  %1291 = vmatprep.mubr.msk.bf16.mxu0 (!%p244_p10), %vm1545_vm1, %v1544_v0  ;;  %s1547_s16 = smov (!%p244_p10), 112   ;;  %v1548_v6 = vmov (!%p244_p10), -inf   ;;  %v1549_v17 = vmov (!%p244_p10), 0  }
  0x10   : > { %325 = vst.msk [vmem:[#allocation4 + $0x10] sm:$0xff] (!%p244_p10), %vm322_vm0, %v1544_v0  ;;  %326 = vst.msk [vmem:[#allocation4 + $0x18] sm:$0xff] (!%p244_p10), %vm322_vm0, %v1544_v0  ;;  %1313 = vmatprep.subr.bf16.mxu1 (!%p244_p10), %v1544_v0  ;;  %1315 = vmatprep.mubr.msk.bf16.mxu1 (!%p244_p10), %vm1545_vm1, %v1544_v0  ;;  %s1550_s17 = smov (!%p244_p10), 104   ;;  %vm412_vm3 = vcmask (!%p244_p10), 1043456   ;;  %s1262_s24 = sshll.u32 (!%p244_p10), %s1534_s21, 7  ;;  %vm1115_vm4 = vcmask (!%p244_p10), 261120  }
  0x11   : > { %314 = vst.msk [vmem:[#allocation2] sm:$0xff] (!%p244_p10), %vm313_vm2, %v1548_v6  ;;  %315 = vst.msk [vmem:[#allocation2 + $0x8] sm:$0xff] (!%p244_p10), %vm313_vm2, %v1548_v6  ;;  %1436 = vset.pattern.permute.xlu0 (!%p244_p10), %v1549_v17  ;;  %1437 = vset.pattern.permute.xlu1 (!%p244_p10), %v1549_v17  ;;  %s1551_s10 = smov (!%p244_p10), [#allocation5]  }
  0x12   : > { %316 = vst.msk [vmem:[#allocation2 + $0x10] sm:$0xff] (!%p244_p10), %vm313_vm2, %v1548_v6  ;;  %317 = vst.msk [vmem:[#allocation2 + $0x18] sm:$0xff] (!%p244_p10), %vm313_vm2, %v1548_v6 }
  0x13   : > { %318 = vst.msk [vmem:[#allocation3] sm:$0xff] (!%p244_p10), %vm313_vm2, %v1544_v0  ;;  %319 = vst.msk [vmem:[#allocation3 + $0x8] sm:$0xff] (!%p244_p10), %vm313_vm2, %v1544_v0 }
  0x14   : > { %320 = vst.msk [vmem:[#allocation3 + $0x10] sm:$0xff] (!%p244_p10), %vm313_vm2, %v1544_v0  ;;  %321 = vst.msk [vmem:[#allocation3 + $0x18] sm:$0xff] (!%p244_p10), %vm313_vm2, %v1544_v0 }
  0x16   : > { %s288_s7 = scalar_select %p287_p11, %s1534_s21, 1 }
  0x18   : > { %s1653_s8 = sshll.u32 %s288_s7, 2  ;;  %v1694_v22 = vld [vmem:[#allocation2] sm:$0xff]  ;;  %v516_v56 = vld [vmem:[#allocation2 + $0x8] sm:$0xff] }
  0x19   : > { %s300_s11 = scalar_lea.vmem %s1861_s1, %s1653_s8  ;;  %s293_s14 = scalar_lea.vmem %s1860_s0, %s1653_s8  ;;  %v1725_v38 = vld [vmem:[#allocation2 + $0x10] sm:$0xff]  ;;  %v789_v59 = vld [vmem:[#allocation2 + $0x18] sm:$0xff] }
  0x1a   : > { %v328_v1 = vld [vmem:[%s300_s11] sm:$0xf]  ;;  %s307_s27 = scalar_lea.vmem %s1862_s2, %s1653_s8  ;;  %s1813_s8 = scalar_lea.hbm %s1865_s5, %s1262_s24 }
  0x1b   : > { %v335_v2 = vsel %vm322_vm0, %v328_v1, 0  ;;  %v1248_v3 = vcombine.low %v328_v1, %v328_v1  ;;  %v327_v4 = vld [vmem:[%s293_s14] sm:$0xf]  ;;  %s284_s14 = sand.u32 1, %s1526_s19   ;;  %s1468_s11 = sshll.u32 %s1551_s10, 4  ;;  %s1469_s11 = int_to_ptr.vmem [resolvable:$false] %s1468_s11 }
  0x1c   : > { %1290 = vmatpush3.bf16.xpose.msra.mxu0 %v335_v2  ;;  %v1247_v5 = vcombine.low %v327_v4, %v327_v4  ;;  %v329_v26 = vld [vmem:[%s307_s27] sm:$0xf]  ;;  %s1118_s21 = scalar_lea.sflag [#allocation6], %s284_s14  ;;  %s1470_s12 = scalar_lea.vmem %s1469_s11, 256 }
  0x1d   : > { %467 = vrot.lane.b32.xlu1 %v1248_v3, %s1546_s15  ;;  %1295 = vmatprep.subr.bf16.mxu0 %v1544_v0  ;;  %v414_v27 = vsel %vm412_vm3, %v329_v26, 0  ;;  %v1250_v61 = vcombine.low %v329_v26, %v329_v26 }
  0x21   : > { %462 = vrot.lane.b32.xlu1 %v1247_v5, %s1546_s15 }
  0x23   : > { %1292 = vmatmul.mubr.msk.bf16.vlgmr.msra.gmra.mrb[0].mxu0 %vm322_vm0, %v327_v4 }
  0x24   : > { %1297 = vmatprep.mubr.msk.bf16.mxu0 %vm1545_vm1, %v1544_v0  ;;  %1296 = vmatpush3.bf16.msra.mxu0 %v414_v27 }
  0x25   : > { %605 = vrot.lane.b32.xlu1 %v1248_v3, %s1547_s16  ;;  %1301 = vmatprep.subr.bf16.mxu0 %v1544_v0 }
  0x29   : > { %603 = vrot.lane.b32.xlu1 %v1247_v5, %s1547_s16 }
  0x2d   : > { %740 = vrot.lane.b32.xlu1 %v1248_v3, %s1550_s17 }
  0x31   : > { %738 = vrot.lane.b32.xlu1 %v1247_v5, %s1550_s17 }
  0x8f   : > { %v468_v7 = vpop.permute.xlu1 %467 }
  0x90   : > { %v473_v36 = vsel %vm322_vm0, %v468_v7, 0 }
  0x93   : > { %v463_v8 = vpop.permute.xlu1 %462 }
  0x97   : > { %v606_v9 = vpop.permute.xlu1 %605 }
  0x98   : > { %v611_v10 = vsel %vm322_vm0, %v606_v9, 0 }
  0x99   : > { %1314 = vmatpush3.bf16.xpose.msra.mxu1 %v611_v10 }
  0x9a   : > { %1325 = vmatprep.subr.bf16.mxu1 %v1544_v0 }
  0x9b   : > { %v604_v11 = vpop.permute.xlu1 %603 }
  0x9f   : > { %v741_v28 = vpop.permute.xlu1 %740 }
  0xa0   : > { %1316 = vmatmul.mubr.msk.bf16.vlgmr.msra.gmra.mrb[0].mxu1 %vm322_vm0, %v604_v11  ;;  %v746_v29 = vsel %vm322_vm0, %v741_v28, 0 }
  0xa1   : > { %1327 = vmatprep.mubr.msk.bf16.mxu1 %vm1545_vm1, %v1544_v0  ;;  %1326 = vmatpush3.bf16.xpose.msra.mxu1 %v746_v29 }
  0xa2   : > { %1337 = vmatprep.subr.bf16.mxu1 %v1544_v0 }
  0xa3   : > { %v739_v30 = vpop.permute.xlu1 %738 }
  0xa8   : > { %1328 = vmatmul.mubr.msk.bf16.vlgmr.msra.gmra.mrb[4].mxu1 %vm322_vm0, %v739_v30 }
  0xa9   : > { %1339 = vmatprep.mubr.msk.bf16.mxu1 %vm1545_vm1, %v1544_v0 }
  0xf6   : > { %v371_v12 = vpop.f32.mrb[0].mxu0 }
  0xf7   : > { %v1293_v13 = vpop.f32.mrb[1].mxu0  ;;  %v378_v14 = vsel %vm322_vm0, %v371_v12, -inf }
  0xf8   : > { %379 = vmax.xlane.f32.xlu0 %v378_v14  ;;  %v374_v15 = vpop.f32.mrb[2].mxu0 }
  0xf9   : > { %v1294_v16 = vpop.f32.mrb[3].mxu0 }
 0x173   : > { %v1692_v18 = vpop.f32.mrb[0].mxu1 }
 0x174   : > { %v1317_v19 = vpop.f32.mrb[1].mxu1  ;;  %v655_v31 = vsel %vm322_vm0, %v1692_v18, -inf }
 0x175   : > { %v650_v20 = vpop.f32.mrb[2].mxu1 }
 0x176   : > { %v1318_v21 = vpop.f32.mrb[3].mxu1 }
 0x17b   : > { %v782_v42 = vpop.f32.mrb[4].mxu1 }
 0x17c   : > { %v1329_v43 = vpop.f32.mrb[5].mxu1  ;;  %v790_v55 = vsel %vm322_vm0, %v782_v42, -inf }
 0x17d   : > { %v785_v44 = vpop.f32.mrb[6].mxu1  ;;  %v533_v43 = vld [vmem:[#allocation3 + $0x8] sm:$0xff] }
 0x17e   : > { %v1330_v45 = vpop.f32.mrb[7].mxu1 }
 0x185   : > { %v380_v23 = vpop.xlane.xlu0 %379 }
 0x186   : > { %v1697_v24 = vmax.f32 %v1694_v22, %v380_v23 }
 0x188   : > { %v382_v25 = vsub.f32 %v1694_v22, %v1697_v24  ;;  %458 = vst.msk [vmem:[#allocation2] sm:$0xff] %vm313_vm2, %v1697_v24  ;;  %387 = vperm.xlu0 %1436, %v1697_v24   ;;  %v393_v24 = vld [vmem:[#allocation3] sm:$0xff] }
 0x18a   : > { %v383_v30 = vmul.f32 1.442695, %v382_v25 }
 0x1a7   : > { %656 = vmax.xlane.f32.xlu0 %v655_v31 }
 0x207   : > { %v388_v32 = vpop.permute.xlu0 %387 }
 0x208   : > { %v390_v33 = vsub.f32 %v371_v12, %v388_v32 }
 0x20a   : > { %v391_v34 = vmul.f32 1.442695, %v390_v33 }
 0x20c   : > { %1440 = vpow2.f32 %v391_v34 }
 0x216   : > { %v1441_v35 = vpop.eup %1440 }
 0x217   : > { %v408_v37 = vpack.c.bf16 %v1441_v35, %v1441_v35  ;;  %v395_v2 = vsel %vm322_vm0, %v1441_v35, 0.0 }
 0x219   : > { %1298 = vmatmul.mubr.msk.bf16.vlgmr.msra.gmra.mrb[4].mxu0 %vm322_vm0, %v408_v37 }
 0x21a   : > { %1302 = vmatpush3.bf16.xpose.msra.mxu0 %v473_v36  ;;  %1303 = vmatprep.mubr.msk.bf16.mxu0 %vm1545_vm1, %v1544_v0 }
 0x21b   : > { %1307 = vmatprep.subr.bf16.mxu0 %v1544_v0 }
 0x221   : > { %1304 = vmatmul.mubr.msk.bf16.vlgmr.msra.gmra.mrb[8].mxu0 %vm322_vm0, %v463_v8 }
 0x222   : > { %1309 = vmatprep.mubr.msk.bf16.mxu0 %vm1545_vm1, %v1544_v0 }
 0x234   : > { %v657_v39 = vpop.xlane.xlu0 %656 }
 0x235   : > { %v1728_v40 = vmax.f32 %v1725_v38, %v657_v39 }
 0x237   : > { %v659_v41 = vsub.f32 %v1725_v38, %v1728_v40  ;;  %737 = vst.msk [vmem:[#allocation2 + $0x10] sm:$0xff] %vm313_vm2, %v1728_v40  ;;  %664 = vperm.xlu0 %1436, %v1728_v40  }
 0x239   : > { %v660_v31 = vmul.f32 1.442695, %v659_v41  ;;  %v887_v41 = vld [vmem:[%s1863_s3] sm:$0xf] }
 0x2b6   : > { %v665_v3 = vpop.permute.xlu0 %664 }
 0x2b7   : > { %v667_v4 = vsub.f32 %v1692_v18, %v665_v3 }
 0x2b9   : > { %v668_v7 = vmul.f32 1.442695, %v667_v4 }
 0x2ec   : > { %v1735_v46 = vpop.f32.mrb[4].mxu0 }
 0x2ed   : > { %v1299_v47 = vpop.f32.mrb[5].mxu0 }
 0x2ee   : > { %v453_v48 = vpop.f32.mrb[6].mxu0  ;;  %v671_v47 = vld [vmem:[#allocation3 + $0x10] sm:$0xff] }
 0x2ef   : > { %v1300_v49 = vpop.f32.mrb[7].mxu0 }
 0x2f4   : > { %v509_v50 = vpop.f32.mrb[8].mxu0 }
 0x2f5   : > { %v1305_v51 = vpop.f32.mrb[9].mxu0  ;;  %v517_v52 = vsel %vm322_vm0, %v509_v50, -inf }
 0x2f6   : > { %518 = vmax.xlane.f32.xlu1 %v517_v52  ;;  %v512_v53 = vpop.f32.mrb[10].mxu0  ;;  %v806_v51 = vld [vmem:[#allocation3 + $0x18] sm:$0xff] }
 0x2f7   : > { %v1306_v54 = vpop.f32.mrb[11].mxu0 }
 0x2fa   : > { %791 = vmax.xlane.f32.xlu1 %v790_v55 }
 0x383   : > { %v519_v57 = vpop.xlane.xlu1 %518 }
 0x384   : > { %v520_v58 = vmax.f32 %v516_v56, %v519_v57 }
 0x386   : > { %v521_v60 = vsub.f32 %v516_v56, %v520_v58  ;;  %602 = vst.msk [vmem:[#allocation2 + $0x8] sm:$0xff] %vm313_vm2, %v520_v58  ;;  %526 = vperm.xlu1 %1437, %v520_v58   ;;  %v401_v56 = vld [vmem:[#allocation4] sm:$0xff] }
 0x387   : > { %v792_v62 = vpop.xlane.xlu1 %791 }
 0x388   : > { %v793_v63 = vmax.f32 %v789_v59, %v792_v62  ;;  %v522_v29 = vmul.f32 1.442695, %v521_v60 }
 0x38a   : > { %552 = vrot.lane.b32.xlu1 %v1250_v61, %s1546_s15  ;;  %v794_v1 = vsub.f32 %v789_v59, %v793_v63  ;;  %872 = vst.msk [vmem:[#allocation2 + $0x18] sm:$0xff] %vm313_vm2, %v793_v63  ;;  %s1241_s15 = sshll.u32 %s284_s14, 3 }
 0x38b   : > { %s286_s25 = scalar_lea.vmem [#allocation5], %s1241_s15 }
 0x38c   : > { %v795_v33 = vmul.f32 1.442695, %v794_v1  ;;  %s1132_s27 = sshll.u32 %s286_s25, 4  ;;  %s1815_s27 = int_to_ptr.vmem [resolvable:$true] %s1132_s27 }
 0x38d   : > { %s1464_s9 = scalar_lea.vmem %s1815_s27, 128  ;;  %p1471_p1 = scmp.lt.s32.totalorder %s1815_s27, %s1469_s11 }
 0x38e   : > { %799 = vperm.xlu1 %1437, %v793_v63   ;;  %p1465_p12 = scmp.ne.s32.totalorder %s1815_s27, %s1464_s9  ;;  %p1472_p2 = scmp.lt.s32.totalorder %s1470_s12, %s1464_s9 }
 0x390   : > { %p1466_p13 = pnand %p1465_p12, %p1622_p4  ;;  %p1473_p3 = por %p1472_p2, %p1471_p1 }
 0x392   : > { %687 = vrot.lane.b32.xlu1 %v1250_v61, %s1547_s16  ;;  %p1467_p0 = pneg %p1466_p13 }
 0x394   : > { %p1474_p5 = pnand %p1473_p3, %p1467_p0 }
 0x396   : > { %822 = vrot.lane.b32.xlu1 %v1250_v61, %s1550_s17 }
 0x3ba   : > { %396 = vadd.xlane.f32.xlu1 %v395_v2 }
 0x405   : > { %v527_v5 = vpop.permute.xlu1 %526 }
 0x406   : > { %v529_v6 = vsub.f32 %v509_v50, %v527_v5 }
 0x408   : > { %v530_v8 = vmul.f32 1.442695, %v529_v6  ;;  %v951_v6 = vld [vmem:[%s1863_s3 + $0x4] sm:$0xf] }
 0x409   : > { %v553_v9 = vpop.permute.xlu1 %552 }
 0x40a   : > { %1442 = vpow2.f32 %v530_v8  ;;  %v558_v10 = vsel %vm412_vm3, %v553_v9, 0  ;;  %v956_v8 = vsel %vm412_vm3, %v951_v6, 0  ;;  %v541_v9 = vld [vmem:[#allocation4 + $0x8] sm:$0xff] }
 0x40b   : > { %1308 = vmatpush3.bf16.msra.mxu0 %v558_v10  ;;  %1444 = vpow2.f32 %v668_v7 }
 0x40c   : > { %1319 = vmatprep.subr.bf16.mxu0 %v1544_v0 }
 0x40d   : > { %v800_v11 = vpop.permute.xlu1 %799 }
 0x40e   : > { %v802_v12 = vsub.f32 %v782_v42, %v800_v11  ;;  %v892_v42 = vsel %vm412_vm3, %v887_v41, 0  ;;  %v1067_v41 = vld [vmem:[%s1863_s3 + $0xc] sm:$0xf] }
 0x40f   : > { %1338 = vmatpush3.bf16.msra.mxu1 %v892_v42 }
 0x410   : > { %v803_v13 = vmul.f32 1.442695, %v802_v12  ;;  %1343 = vmatprep.subr.bf16.mxu1 %v1544_v0 }
 0x411   : > { %v688_v14 = vpop.permute.xlu1 %687 }
 0x412   : > { %1446 = vpow2.f32 %v803_v13  ;;  %v693_v18 = vsel %vm412_vm3, %v688_v14, 0 }
 0x413   : > { %1448 = vpow2.f32 %v522_v29 }
 0x414   : > { %v1443_v15 = vpop.eup %1442  ;;  %1450 = vpow2.f32 %v383_v30 }
 0x415   : > { %v535_v16 = vsel %vm322_vm0, %v1443_v15, 0.0  ;;  %v548_v17 = vpack.c.bf16 %v1443_v15, %v1443_v15  ;;  %v1445_v19 = vpop.eup %1444  ;;  %v823_v21 = vpop.permute.xlu1 %822  ;;  %1452 = vpow2.f32 %v660_v31 }
 0x416   : > { %536 = vadd.xlane.f32.xlu0 %v535_v16  ;;  %v673_v20 = vsel %vm322_vm0, %v1445_v19, 0.0  ;;  %v686_v27 = vpack.c.bf16 %v1445_v19, %v1445_v19  ;;  %v828_v28 = vsel %vm412_vm3, %v823_v21, 0  ;;  %1454 = vpow2.f32 %v795_v33  ;;  %v679_v16 = vld [vmem:[#allocation4 + $0x10] sm:$0xff] }
 0x417   : > { %1310 = vmatmul.mubr.msk.bf16.vlgmr.msra.gmra.mrb[12].mxu0 %vm322_vm0, %v548_v17 }
 0x418   : > { %1320 = vmatpush3.bf16.msra.mxu0 %v693_v18  ;;  %1321 = vmatprep.mubr.msk.bf16.mxu0 %vm1545_vm1, %v1544_v0 }
 0x419   : > { %1331 = vmatprep.subr.bf16.mxu0 %v1544_v0 }
 0x41a   : > { %674 = vadd.xlane.f32.xlu0 %v673_v20 }
 0x41c   : > { %v1447_v23 = vpop.eup %1446 }
 0x41d   : > { %v808_v26 = vsel %vm322_vm0, %v1447_v23, 0.0  ;;  %v821_v32 = vpack.c.bf16 %v1447_v23, %v1447_v23  ;;  %v1449_v34 = vpop.eup %1448 }
 0x41e   : > { %809 = vadd.xlane.f32.xlu1 %v808_v26  ;;  %v1451_v35 = vpop.eup %1450  ;;  %v534_v44 = vmul.f32 %v1449_v34, %v533_v43  ;;  %v1072_v43 = vsel %vm412_vm3, %v1067_v41, 0 }
 0x41f   : > { %1322 = vmatmul.mubr.msk.bf16.vlgmr.msra.gmra.mrb[16].mxu0 %vm322_vm0, %v686_v27  ;;  %v1453_v36 = vpop.eup %1452  ;;  %v394_v25 = vmul.f32 %v1451_v35, %v393_v24  ;;  %v814_v27 = vld [vmem:[#allocation4 + $0x18] sm:$0xff] }
 0x420   : > { %1332 = vmatpush3.bf16.msra.mxu0 %v828_v28  ;;  %1333 = vmatprep.mubr.msk.bf16.mxu0 %vm1545_vm1, %v1544_v0  ;;  %v1455_v22 = vpop.eup %1454  ;;  %v672_v49 = vmul.f32 %v1453_v36, %v671_v47 }
 0x421   : > { %v807_v53 = vmul.f32 %v1455_v22, %v806_v51 }
 0x427   : > { %1334 = vmatmul.mubr.msk.bf16.vlgmr.msra.gmra.mrb[20].mxu0 %vm322_vm0, %v821_v32 }
 0x42f   : > { %544 = vperm.xlu1 %1437, %v1449_v34  }
 0x430   : > { %404 = vperm.xlu0 %1436, %v1451_v35  }
 0x434   : > { %682 = vperm.xlu0 %1436, %v1453_v36  }
 0x438   : > { %817 = vperm.xlu0 %1436, %v1455_v22   ;;  %v1009_v22 = vld [vmem:[%s1863_s3 + $0x8] sm:$0xf] }
 0x447   : > { %v397_v37 = vpop.xlane.xlu1 %396 }
 0x448   : > { %v398_v39 = vadd.f32 %v397_v37, %v394_v25  ;;  %v1014_v37 = vsel %vm412_vm3, %v1009_v22, 0 }
 0x44a   : > { %400 = vst.msk [vmem:[#allocation3] sm:$0xff] %vm313_vm2, %v398_v39 }
 0x451   : > { %v877_v38 = vld [vmem:[#allocation3] sm:$0xff] }
 0x452   : > { %1456 = vrcp.f32 %v877_v38 }
 0x45c   : > { %v1457_v40 = vpop.eup %1456 }
 0x45d   : > { %882 = vperm.xlu1 %1437, %v1457_v40  }
 0x4a3   : > { %v537_v45 = vpop.xlane.xlu0 %536 }
 0x4a4   : > { %v538_v48 = vadd.f32 %v537_v45, %v534_v44 }
 0x4a6   : > { %539 = vst.msk [vmem:[#allocation3 + $0x8] sm:$0xff] %vm313_vm2, %v538_v48 }
 0x4a7   : > { %v675_v50 = vpop.xlane.xlu0 %674 }
 0x4a8   : > { %v676_v52 = vadd.f32 %v675_v50, %v672_v49  ;;  %v1257_v49 = vld [vmem:[%s1864_s4] ss:$0 sm:$0xff] }
 0x4aa   : > { %677 = vst.msk [vmem:[#allocation3 + $0x10] sm:$0xff] %vm313_vm2, %v676_v52 }
 0x4ab   : > { %v810_v54 = vpop.xlane.xlu1 %809 }
 0x4ac   : > { %v811_v55 = vadd.f32 %v810_v54, %v807_v53 }
 0x4ad   : > { %v941_v57 = vld [vmem:[#allocation3 + $0x8] sm:$0xff] }
 0x4ae   : > { %812 = vst.msk [vmem:[#allocation3 + $0x18] sm:$0xff] %vm313_vm2, %v811_v55  ;;  %1458 = vrcp.f32 %v941_v57 }
 0x4af   : > { %v405_v58 = vpop.permute.xlu0 %404  ;;  %v545_v3 = vpop.permute.xlu1 %544 }
 0x4b0   : > { %v407_v59 = vmul.f32 %v405_v58, %v401_v56  ;;  %v547_v10 = vmul.f32 %v545_v3, %v541_v9 }
 0x4b1   : > { %v999_v60 = vld [vmem:[#allocation3 + $0x10] sm:$0xff] }
 0x4b2   : > { %v456_v61 = vadd.f32 %v1735_v46, %v407_v59  ;;  %1460 = vrcp.f32 %v999_v60 }
 0x4b3   : > { %v683_v17 = vpop.permute.xlu0 %682 }
 0x4b4   : > { %457 = vst.msk [vmem:[#allocation4] sm:$0xff] %vm322_vm0, %v456_v61  ;;  %v685_v18 = vmul.f32 %v683_v17, %v679_v16 }
 0x4b5   : > { %v1057_v62 = vld [vmem:[#allocation3 + $0x18] sm:$0xff] }
 0x4b6   : > { %1462 = vrcp.f32 %v1057_v62 }
 0x4b7   : > { %v818_v28 = vpop.permute.xlu0 %817 }
 0x4b8   : > { %v1459_v63 = vpop.eup %1458  ;;  %v820_v29 = vmul.f32 %v818_v28, %v814_v27 }
 0x4b9   : > { %946 = vperm.xlu1 %1437, %v1459_v63  }
 0x4bb   : > { %v879_v4 = vld [vmem:[#allocation4] sm:$0xff] }
 0x4bc   : > { %v1461_v1 = vpop.eup %1460 }
 0x4bd   : > { %1004 = vperm.xlu1 %1437, %v1461_v1  }
 0x4c0   : > { %v1463_v2 = vpop.eup %1462 }
 0x4c1   : > { %1062 = vperm.xlu0 %1436, %v1463_v2  }
 0x4dc   : > { %v883_v5 = vpop.permute.xlu1 %882 }
 0x4dd   : > { %v885_v7 = vmul.f32 %v883_v5, %v879_v4 }
 0x4df   : > { %v886_v46 = vpack.c.bf16 %v885_v7, %v885_v7 }
 0x4e1   : > { %1340 = vmatmul.mubr.msk.bf16.vlgmr.msra.gmra.mrb[8].mxu1 %vm322_vm0, %v886_v46 }
 0x4e2   : > { %1344 = vmatpush3.bf16.msra.mxu1 %v956_v8  ;;  %1345 = vmatprep.mubr.msk.bf16.mxu1 %vm1545_vm1, %v1544_v0 }
 0x4e3   : > { %1349 = vmatprep.subr.bf16.mxu1 %v1544_v0 }
 0x4ea   : > { %v594_v11 = vpop.f32.mrb[12].mxu0 }
 0x4eb   : > { %v600_v12 = vadd.f32 %v594_v11, %v547_v10  ;;  %v1311_v13 = vpop.f32.mrb[13].mxu0 }
 0x4ec   : > { %v597_v14 = vpop.f32.mrb[14].mxu0 }
 0x4ed   : > { %601 = vst.msk [vmem:[#allocation4 + $0x8] sm:$0xff] %vm322_vm0, %v600_v12  ;;  %v1312_v15 = vpop.f32.mrb[15].mxu0 }
 0x4f2   : > { %v729_v19 = vpop.f32.mrb[16].mxu0 }
 0x4f3   : > { %v735_v20 = vadd.f32 %v729_v19, %v685_v18  ;;  %v1323_v21 = vpop.f32.mrb[17].mxu0 }
 0x4f4   : > { %v732_v23 = vpop.f32.mrb[18].mxu0  ;;  %v943_v36 = vld [vmem:[#allocation4 + $0x8] sm:$0xff] }
 0x4f5   : > { %736 = vst.msk [vmem:[#allocation4 + $0x10] sm:$0xff] %vm322_vm0, %v735_v20  ;;  %v1324_v26 = vpop.f32.mrb[19].mxu0 }
 0x4fa   : > { %v864_v30 = vpop.f32.mrb[20].mxu0 }
 0x4fb   : > { %v870_v31 = vadd.f32 %v864_v30, %v820_v29  ;;  %v1335_v32 = vpop.f32.mrb[21].mxu0 }
 0x4fc   : > { %v867_v33 = vpop.f32.mrb[22].mxu0  ;;  %v1001_v38 = vld [vmem:[#allocation4 + $0x10] sm:$0xff] }
 0x4fd   : > { %871 = vst.msk [vmem:[#allocation4 + $0x18] sm:$0xff] %vm322_vm0, %v870_v31  ;;  %v1336_v34 = vpop.f32.mrb[23].mxu0 }
 0x504   : > { %v1059_v45 = vld [vmem:[#allocation4 + $0x18] sm:$0xff] }
 0x538   : > { %v947_v35 = vpop.permute.xlu1 %946 }
 0x539   : > { %v949_v24 = vmul.f32 %v947_v35, %v943_v36 }
 0x53b   : > { %v950_v25 = vpack.c.bf16 %v949_v24, %v949_v24 }
 0x53c   : > { %v1005_v39 = vpop.permute.xlu1 %1004 }
 0x53d   : > { %1346 = vmatmul.mubr.msk.bf16.vlgmr.msra.gmra.mrb[8].mxu1 %vm322_vm0, %v950_v25  ;;  %v1007_v40 = vmul.f32 %v1005_v39, %v1001_v38 }
 0x53e   : > { %1350 = vmatpush3.bf16.msra.mxu1 %v1014_v37  ;;  %1351 = vmatprep.mubr.msk.bf16.mxu1 %vm1545_vm1, %v1544_v0 }
 0x53f   : > { %1355 = vmatprep.subr.bf16.mxu1 %v1544_v0  ;;  %v1008_v42 = vpack.c.bf16 %v1007_v40, %v1007_v40 }
 0x540   : > { %v1063_v44 = vpop.permute.xlu0 %1062 }
 0x541   : > { %v1065_v47 = vmul.f32 %v1063_v44, %v1059_v45 }
 0x543   : > { %v1066_v48 = vpack.c.bf16 %v1065_v47, %v1065_v47 }
 0x549   : > { %1352 = vmatmul.mubr.msk.bf16.vlgmr.msra.gmra.mrb[8].mxu1 %vm322_vm0, %v1008_v42 }
 0x54a   : > { %1356 = vmatpush3.bf16.msra.mxu1 %v1072_v43  ;;  %1357 = vmatprep.mubr.msk.bf16.mxu1 %vm1545_vm1, %v1544_v0 }
 0x555   : > { %1358 = vmatmul.mubr.msk.bf16.vlgmr.msra.gmra.mrb[8].mxu1 %vm322_vm0, %v1066_v48 }
 0x628   : > { %v1108_v50 = vpop.f32.mrb[8].mxu1 }
 0x629   : > { %v1361_v51 = vadd.f32 %v1257_v49, %v1108_v50  ;;  %v1359_v0 = vpop.f32.mrb[9].mxu1 }
 0x62a   : > { %v1111_v52 = vpop.f32.mrb[10].mxu1 }
 0x62b   : > { %v1360_v53 = vpop.f32.mrb[11].mxu1  ;;  %1116 = vst.msk [vmem:[%s286_s25] sm:$0xff] %vm1115_vm4, %v1361_v51 }
 0x62c   : > { %1477 = shalt.err (!%p1474_p5)
}
 0x62d   : > { %s1478_s13 = scalar_lea.hbm %s1813_s8, 128  ;;  %s1482_s16 = scalar_lea.hbm %s1865_s5, 256 }
 0x62e   : > { %p1479_p6 = scmp.ne.s32.totalorder %s1813_s8, %s1478_s13  ;;  %p1483_p10 = scmp.lt.u32.totalorder %s1813_s8, %s1865_s5 }
 0x62f   : > { %p1484_p11 = scmp.lt.u32.totalorder %s1482_s16, %s1478_s13  ;;  %p1486_p13 = scmp.lt.u32.totalorder %s1478_s13, %s1813_s8 }
 0x630   : > { %p1480_p7 = pnand %p1479_p6, %p1622_p4 }
 0x631   : > { %p1485_p12 = por %p1484_p11, %p1483_p10 }
 0x632   : > { %p1481_p9 = pneg %p1480_p7 }
 0x633   : > { %p1487_p0 = por %p1486_p13, %p1485_p12 }
 0x635   : > { %p1488_p1 = pnand %p1487_p0, %p1481_p9 }
 0x637   : > { %1491 = shalt.err (!%p1488_p1)
}
 0x638   : > { %1374 = dma.vmem_to_hbm [thread:$0]  (%p1622_p4), %s1815_s27, 128, %s1813_s8, %s1118_s21  }
 0x639 PF: > { %p1380_p2 = scmp.ge.s32.totalorder %s1542_s23, 2  ;;  %s1144_s25 = sand.u32 1, %s1522_s18  }
 0x63a   : > { %s1145_s29 = scalar_lea.sflag [#allocation6], %s1144_s25 }
 0x63b   : > { %p1377_p3 = pnand %p1380_p2, %p1629_p8 }
 0x63d   : > { %1517 = dma.done.wait (!%p1377_p3), %s1145_s29, 128  }
 0x63e   : > { %1519 = vsyncadd (!%p1377_p3), %s1145_s29, 4294967168  ;;  %s18_s23 = sadd.s32 1, %s1542_s23   ;;  %s1868_s18 = smov %s1526_s19 }
 0x63f   : > { %p15_p5 = scmp.ge.s32.totalorder %s18_s23, 4   ;;  %s1869_s19 = smov %s1530_s20 }
 0x640   : > { %s1870_s20 = smov %s1635_s6  ;;  %s1871_s21 = smov %s1538_s22 }
 0x641   : > { %s1872_s22 = smov %s1874_s26  ;;  %17 = sbr.rel (!%p15_p5) target bundleno = 4 (0x4), region = 98 }
 0x648   :  { %1150 = vsyncpa [#allocation6], 1 }
 0x649   :  { %1152 = vsyncpa [#allocation6 + $0x1], 1 }

</bundles_post_ra>
